<compile_context>
chip_gen: v5e
topology: v5e:2x2
jax: 0.10.0
libtpu: 0.0.40
codegen_flags: <defaults>
</compile_context>

<pallas_src>
import jax
import jax.numpy as jnp
from jax.experimental import pallas as pl
from jax.experimental.pallas import tpu as pltpu


def _round_up(n, m):
    return ((n + m - 1) // m) * m


def stock_mlp_kernel(x_ref,
                     w1_ref, b1_ref,
                     w2_ref, b2_ref,
                     w3_ref, b3_ref,
                     w4_ref, b4_ref,
                     o_ref):
    """One batch tile of the fused 4-layer MLP (4 MXU matmuls + VPU elementwise).

    Matmul operands are cast to the weights' dtype (f32 or bf16); accumulation,
    bias add and LeakyReLU stay in f32 (v5e VPU has no bf16 ALU path).
    """
    def layer(h, w_ref, b_ref, act):
        y = jnp.dot(h.astype(w_ref.dtype), w_ref[...],
                    preferred_element_type=jnp.float32)
        y = y + b_ref[...]
        if act:
            y = jnp.where(y > 0, y, 0.1 * y)      # LeakyReLU(0.1)
        return y

    h = x_ref[...].astype(jnp.float32)
    h = layer(h, w1_ref, b1_ref, True)
    h = layer(h, w2_ref, b2_ref, True)
    h = layer(h, w3_ref, b3_ref, True)
    h = layer(h, w4_ref, b4_ref, False)           # final Linear: no activation
    o_ref[...] = h.astype(o_ref.dtype)


def _prepare_params(params, compute_dtype):
    """Zero-pad hidden output widths to multiples of 128 lanes (final layer
    keeps its true width) and cast weights to compute_dtype. Padding is done
    once here, never inside the kernel; padded rows/cols are zeros so they are
    numerically inert (LeakyReLU(0) = 0, zero rows contribute nothing)."""
    prepared = []
    n_layers = len(params)
    prev_out = params[0][0].shape[0]          # n_in: x feature dim, unpadded
    for i, (w, b) in enumerate(params):
        d_in, d_out = w.shape
        d_in_pad = prev_out
        d_out_pad = d_out if i == n_layers - 1 else _round_up(d_out, 128)
        w_p = jnp.zeros((d_in_pad, d_out_pad), jnp.float32)
        w_p = w_p.at[:d_in, :d_out].set(w.astype(jnp.float32))
        b_p = jnp.zeros((1, d_out_pad), jnp.float32)
        b_p = b_p.at[:, :d_out].set(jnp.reshape(b, (1, -1)).astype(jnp.float32))
        prepared.append((w_p.astype(compute_dtype), b_p))   # bias stays f32
        prev_out = d_out_pad
    return prepared


def stock_model_forward(x, params, *, compute_dtype=jnp.float32, block_b=512):
    """x: (B, n_in) float32. params: list of (W, b) with W:(in,out), b:(1,out).

    compute_dtype: dtype of the MXU operands (jnp.float32 or jnp.bfloat16);
    accumulation is always f32. block_b: target batch tile (MXU-aligned)."""
    B, n_in = x.shape
    n_out = params[-1][0].shape[1]

    # MXU-aligned batch tile (multiple of 256 -> aligned for 128- and 256-row
    # MXUs); don't exceed the padded batch for tiny inputs.
    tm = min(block_b, _round_up(B, 256))
    b_pad = _round_up(B, tm)
    if b_pad != B:
        x = jnp.pad(x, ((0, b_pad - B), (0, 0)))

    prep = _prepare_params(params, compute_dtype)
    (w1, b1), (w2, b2), (w3, b3), (w4, b4) = prep
    flat = (w1, b1, w2, b2, w3, b3, w4, b4)

    grid = (b_pad // tm,)

    x_spec = pl.BlockSpec((tm, n_in), lambda i: (i, 0))
    # Constant index_map -> weights/biases stay resident in VMEM across steps.
    resident = lambda a: pl.BlockSpec(a.shape, lambda i: (0, 0))
    out_spec = pl.BlockSpec((tm, n_out), lambda i: (i, 0))

    # Advisory cost hint for XLA scheduling around the custom call.
    flops = 0
    bytes_accessed = x.size * x.dtype.itemsize + b_pad * n_out * 4
    for w, b in prep:
        flops += 2 * b_pad * w.shape[0] * w.shape[1]
        bytes_accessed += w.size * w.dtype.itemsize + b.size * b.dtype.itemsize

    out = pl.pallas_call(
        stock_mlp_kernel,
        out_shape=jax.ShapeDtypeStruct((b_pad, n_out), jnp.float32),
        grid=grid,
        in_specs=[x_spec] + [resident(a) for a in flat],
        out_specs=out_spec,
        compiler_params=pltpu.CompilerParams(
            dimension_semantics=("parallel",)),   # engages both TCs on v7x
        cost_estimate=pl.CostEstimate(flops=flops, transcendentals=0,
                                      bytes_accessed=bytes_accessed),
    )(x, *flat)

    return out[:B]


def init_params(key, n_in, n_out):
    """Deterministic init mirroring StockModel.randomize():
    weights ~ N(0, 1/sqrt(n_in)), biases = 0. Shapes from _make_net()."""
    dims = [n_in, n_in ** 4, n_in ** 2, n_out ** 2, n_out]
    params = []
    std = 1.0 / jnp.sqrt(jnp.float32(n_in))
    for i in range(4):
        key, sub = jax.random.split(key)
        w = jax.random.normal(sub, (dims[i], dims[i + 1]), dtype=jnp.float32) * std
        b = jnp.zeros((1, dims[i + 1]), dtype=jnp.float32)
        params.append((w, b))
    return params


def reference_forward(x, params, compute_dtype=jnp.float32):
    """Pure-JAX reference matching the kernel's casting scheme."""
    h = x.astype(jnp.float32)
    for i, (w, b) in enumerate(params):
        h = jnp.dot(h.astype(compute_dtype), w.astype(compute_dtype),
                    preferred_element_type=jnp.float32) + b
        if i < len(params) - 1:
            h = jnp.where(h > 0, h, 0.1 * h)
    return h


if __name__ == "__main__":
    n_in, n_out, batch = 4, 8, 2   # hidden dims: 4 -> 256 -> 16 -> 64 -> 8

    key = jax.random.PRNGKey(0)
    key, xk = jax.random.split(key)
    x = jax.random.normal(xk, (batch, n_in), dtype=jnp.float32)
    params = init_params(key, n_in, n_out)

    # f32 path: bit-faithful to the PyTorch module's forward.
    out = jax.block_until_ready(stock_model_forward(x, params))
    ref = reference_forward(x, params)
    assert out.shape == (batch, n_out)
    assert jnp.allclose(out, ref, atol=1e-4, rtol=1e-4), "f32 mismatch vs reference"

    # bf16-operand path (f32 accumulate): full-rate MXU format on v6e/v7x.
    out_bf16 = jax.block_until_ready(
        stock_model_forward(x, params, compute_dtype=jnp.bfloat16))
    ref_bf16 = reference_forward(x, params, compute_dtype=jnp.bfloat16)
    assert jnp.allclose(out_bf16, ref_bf16, atol=1e-2, rtol=1e-2), \
        "bf16 mismatch vs bf16 reference"

    print("KERNEL_OK")
</pallas_src>

<mosaic_0001>
module attributes {stable_mosaic.version = 11 : i64} {
  func.func @stock_mlp_kernel(%arg0: i32, %arg1: memref<256x4xf32, #tpu.memory_space<vmem>>, %arg2: memref<4x256xf32, #tpu.memory_space<vmem>>, %arg3: memref<1x256xf32, #tpu.memory_space<vmem>>, %arg4: memref<256x128xf32, #tpu.memory_space<vmem>>, %arg5: memref<1x128xf32, #tpu.memory_space<vmem>>, %arg6: memref<128x128xf32, #tpu.memory_space<vmem>>, %arg7: memref<1x128xf32, #tpu.memory_space<vmem>>, %arg8: memref<128x8xf32, #tpu.memory_space<vmem>>, %arg9: memref<1x8xf32, #tpu.memory_space<vmem>>, %arg10: memref<256x8xf32, #tpu.memory_space<vmem>>) attributes {dimension_semantics = [#tpu.dimension_semantics<parallel>], iteration_bounds = array<i64: 1>, scalar_prefetch = 0 : i64, scratch_operands = 0 : i64, tpu.core_type = #tpu.core_type<tc>, window_params = [{transform_indices = @transform_0, window_bounds = array<i64: 256, 4>}, {pipeline_mode = #tpu.pipeline_mode<synchronous>, transform_indices = @transform_1, window_bounds = array<i64: 4, 256>}, {pipeline_mode = #tpu.pipeline_mode<synchronous>, transform_indices = @transform_2, window_bounds = array<i64: 1, 256>}, {pipeline_mode = #tpu.pipeline_mode<synchronous>, transform_indices = @transform_3, window_bounds = array<i64: 256, 128>}, {pipeline_mode = #tpu.pipeline_mode<synchronous>, transform_indices = @transform_4, window_bounds = array<i64: 1, 128>}, {pipeline_mode = #tpu.pipeline_mode<synchronous>, transform_indices = @transform_5, window_bounds = array<i64: 128, 128>}, {pipeline_mode = #tpu.pipeline_mode<synchronous>, transform_indices = @transform_6, window_bounds = array<i64: 1, 128>}, {pipeline_mode = #tpu.pipeline_mode<synchronous>, transform_indices = @transform_7, window_bounds = array<i64: 128, 8>}, {pipeline_mode = #tpu.pipeline_mode<synchronous>, transform_indices = @transform_8, window_bounds = array<i64: 1, 8>}, {transform_indices = @transform_9, window_bounds = array<i64: 256, 8>}]} {
    %c0 = arith.constant 0 : index
    %c0_0 = arith.constant 0 : index
    %0 = vector.load %arg1[%c0, %c0_0] : memref<256x4xf32, #tpu.memory_space<vmem>>, vector<256x4xf32>
    %c0_1 = arith.constant 0 : index
    %c0_2 = arith.constant 0 : index
    %1 = vector.load %arg2[%c0_1, %c0_2] : memref<4x256xf32, #tpu.memory_space<vmem>>, vector<4x256xf32>
    %cst = arith.constant dense<0.000000e+00> : vector<256x256xf32>
    %2 = tpu.matmul %0, %1, %cst {dimension_numbers = #tpu.dot_dimension_numbers<[1], [0], [0], [1], [0, 0, 1, 1], [], []>} : vector<256x4xf32>, vector<4x256xf32>, vector<256x256xf32> -> vector<256x256xf32>
    %c0_3 = arith.constant 0 : index
    %c0_4 = arith.constant 0 : index
    %3 = vector.load %arg3[%c0_3, %c0_4] : memref<1x256xf32, #tpu.memory_space<vmem>>, vector<1x256xf32>
    %4 = vector.broadcast %3 : vector<1x256xf32> to vector<256x256xf32>
    %5 = arith.addf %2, %4 : vector<256x256xf32>
    %cst_5 = arith.constant 0.000000e+00 : f32
    %6 = vector.broadcast %cst_5 : f32 to vector<256x256xf32>
    %7 = arith.cmpf ogt, %5, %6 : vector<256x256xf32>
    %cst_6 = arith.constant 1.000000e-01 : f32
    %8 = vector.broadcast %cst_6 : f32 to vector<256x256xf32>
    %9 = arith.mulf %8, %5 : vector<256x256xf32>
    %10 = arith.select %7, %5, %9 : vector<256x256xi1>, vector<256x256xf32>
    %c0_7 = arith.constant 0 : index
    %c0_8 = arith.constant 0 : index
    %11 = vector.load %arg4[%c0_7, %c0_8] : memref<256x128xf32, #tpu.memory_space<vmem>>, vector<256x128xf32>
    %cst_9 = arith.constant dense<0.000000e+00> : vector<256x128xf32>
    %12 = tpu.matmul %10, %11, %cst_9 {dimension_numbers = #tpu.dot_dimension_numbers<[1], [0], [0], [1], [0, 0, 1, 1], [], []>} : vector<256x256xf32>, vector<256x128xf32>, vector<256x128xf32> -> vector<256x128xf32>
    %c0_10 = arith.constant 0 : index
    %c0_11 = arith.constant 0 : index
    %13 = vector.load %arg5[%c0_10, %c0_11] : memref<1x128xf32, #tpu.memory_space<vmem>>, vector<1x128xf32>
    %14 = vector.broadcast %13 : vector<1x128xf32> to vector<256x128xf32>
    %15 = arith.addf %12, %14 : vector<256x128xf32>
    %cst_12 = arith.constant 0.000000e+00 : f32
    %16 = vector.broadcast %cst_12 : f32 to vector<256x128xf32>
    %17 = arith.cmpf ogt, %15, %16 : vector<256x128xf32>
    %cst_13 = arith.constant 1.000000e-01 : f32
    %18 = vector.broadcast %cst_13 : f32 to vector<256x128xf32>
    %19 = arith.mulf %18, %15 : vector<256x128xf32>
    %20 = arith.select %17, %15, %19 : vector<256x128xi1>, vector<256x128xf32>
    %c0_14 = arith.constant 0 : index
    %c0_15 = arith.constant 0 : index
    %21 = vector.load %arg6[%c0_14, %c0_15] : memref<128x128xf32, #tpu.memory_space<vmem>>, vector<128x128xf32>
    %cst_16 = arith.constant dense<0.000000e+00> : vector<256x128xf32>
    %22 = tpu.matmul %20, %21, %cst_16 {dimension_numbers = #tpu.dot_dimension_numbers<[1], [0], [0], [1], [0, 0, 1, 1], [], []>} : vector<256x128xf32>, vector<128x128xf32>, vector<256x128xf32> -> vector<256x128xf32>
    %c0_17 = arith.constant 0 : index
    %c0_18 = arith.constant 0 : index
    %23 = vector.load %arg7[%c0_17, %c0_18] : memref<1x128xf32, #tpu.memory_space<vmem>>, vector<1x128xf32>
    %24 = vector.broadcast %23 : vector<1x128xf32> to vector<256x128xf32>
    %25 = arith.addf %22, %24 : vector<256x128xf32>
    %cst_19 = arith.constant 0.000000e+00 : f32
    %26 = vector.broadcast %cst_19 : f32 to vector<256x128xf32>
    %27 = arith.cmpf ogt, %25, %26 : vector<256x128xf32>
    %cst_20 = arith.constant 1.000000e-01 : f32
    %28 = vector.broadcast %cst_20 : f32 to vector<256x128xf32>
    %29 = arith.mulf %28, %25 : vector<256x128xf32>
    %30 = arith.select %27, %25, %29 : vector<256x128xi1>, vector<256x128xf32>
    %c0_21 = arith.constant 0 : index
    %c0_22 = arith.constant 0 : index
    %31 = vector.load %arg8[%c0_21, %c0_22] : memref<128x8xf32, #tpu.memory_space<vmem>>, vector<128x8xf32>
    %cst_23 = arith.constant dense<0.000000e+00> : vector<256x8xf32>
    %32 = tpu.matmul %30, %31, %cst_23 {dimension_numbers = #tpu.dot_dimension_numbers<[1], [0], [0], [1], [0, 0, 1, 1], [], []>} : vector<256x128xf32>, vector<128x8xf32>, vector<256x8xf32> -> vector<256x8xf32>
    %c0_24 = arith.constant 0 : index
    %c0_25 = arith.constant 0 : index
    %33 = vector.load %arg9[%c0_24, %c0_25] : memref<1x8xf32, #tpu.memory_space<vmem>>, vector<1x8xf32>
    %34 = vector.broadcast %33 : vector<1x8xf32> to vector<256x8xf32>
    %35 = arith.addf %32, %34 : vector<256x8xf32>
    %c0_26 = arith.constant 0 : index
    %c0_27 = arith.constant 0 : index
    %36 = vector.load %arg10[%c0_26, %c0_27] : memref<256x8xf32, #tpu.memory_space<vmem>>, vector<256x8xf32>
    tpu.vector_store %arg10[%c0_26, %c0_27], %35 {strides = array<i32>} : memref<256x8xf32, #tpu.memory_space<vmem>>, vector<256x8xf32>,
    return
  }
  func.func @transform_0(%arg0: i32) -> (i32, i32) {
    %c0_i32 = arith.constant 0 : i32
    %c0_i32_0 = arith.constant 0 : i32
    return %arg0, %c0_i32 : i32, i32
  }
  func.func @transform_1(%arg0: i32) -> (i32, i32) {
    %c0_i32 = arith.constant 0 : i32
    %c0_i32_0 = arith.constant 0 : i32
    %c0_i32_1 = arith.constant 0 : i32
    return %c0_i32, %c0_i32_0 : i32, i32
  }
  func.func @transform_2(%arg0: i32) -> (i32, i32) {
    %c0_i32 = arith.constant 0 : i32
    %c0_i32_0 = arith.constant 0 : i32
    %c0_i32_1 = arith.constant 0 : i32
    return %c0_i32, %c0_i32_0 : i32, i32
  }
  func.func @transform_3(%arg0: i32) -> (i32, i32) {
    %c0_i32 = arith.constant 0 : i32
    %c0_i32_0 = arith.constant 0 : i32
    %c0_i32_1 = arith.constant 0 : i32
    return %c0_i32, %c0_i32_0 : i32, i32
  }
  func.func @transform_4(%arg0: i32) -> (i32, i32) {
    %c0_i32 = arith.constant 0 : i32
    %c0_i32_0 = arith.constant 0 : i32
    %c0_i32_1 = arith.constant 0 : i32
    return %c0_i32, %c0_i32_0 : i32, i32
  }
  func.func @transform_5(%arg0: i32) -> (i32, i32) {
    %c0_i32 = arith.constant 0 : i32
    %c0_i32_0 = arith.constant 0 : i32
    %c0_i32_1 = arith.constant 0 : i32
    return %c0_i32, %c0_i32_0 : i32, i32
  }
  func.func @transform_6(%arg0: i32) -> (i32, i32) {
    %c0_i32 = arith.constant 0 : i32
    %c0_i32_0 = arith.constant 0 : i32
    %c0_i32_1 = arith.constant 0 : i32
    return %c0_i32, %c0_i32_0 : i32, i32
  }
  func.func @transform_7(%arg0: i32) -> (i32, i32) {
    %c0_i32 = arith.constant 0 : i32
    %c0_i32_0 = arith.constant 0 : i32
    %c0_i32_1 = arith.constant 0 : i32
    return %c0_i32, %c0_i32_0 : i32, i32
  }
  func.func @transform_8(%arg0: i32) -> (i32, i32) {
    %c0_i32 = arith.constant 0 : i32
    %c0_i32_0 = arith.constant 0 : i32
    %c0_i32_1 = arith.constant 0 : i32
    return %c0_i32, %c0_i32_0 : i32, i32
  }
  func.func @transform_9(%arg0: i32) -> (i32, i32) {
    %c0_i32 = arith.constant 0 : i32
    %c0_i32_0 = arith.constant 0 : i32
    return %arg0, %c0_i32 : i32, i32
  }
}

</mosaic_0001>

<bundles_post_ra>
// kernel: tpu_custom_call.1
= control target key start
LH: loop header
LB: loop body
LE: loop exit
PB: predicated region body
PF: predicated region fallthrough
CT: control target
= control target key end

     0   :  { %vm172_vm0 = vcmask 1043456   ;;  %vm75_vm1 = vcmask 31744   ;;  %s2254_s1 = inlined_call_operand.vmem [shape: f32[4,256], index: 1, kind: input, shape index: {}]   ;;  %s2255_s0 = inlined_call_operand.vmem [shape: f32[256,4], index: 0, kind: input, shape index: {}]   ;;  %s2256_s3 = inlined_call_operand.vmem [shape: f32[256,128], index: 3, kind: input, shape index: {}]   ;;  %s2257_s5 = inlined_call_operand.vmem [shape: f32[128,128], index: 5, kind: input, shape index: {}]   ;;  %s2258_s2 = inlined_call_operand.vmem [shape: f32[1,256], index: 2, kind: input, shape index: {}]   ;;  %s2259_s4 = inlined_call_operand.vmem [shape: f32[1,128], index: 4, kind: input, shape index: {}]   ;;  %s2260_s7 = inlined_call_operand.vmem [shape: f32[128,8], index: 7, kind: input, shape index: {}]   ;;  %s2261_s6 = inlined_call_operand.vmem [shape: f32[1,128], index: 6, kind: input, shape index: {}]   ;;  %s2262_s8 = inlined_call_operand.vmem [shape: f32[1,8], index: 8, kind: input, shape index: {}]   ;;  %s2263_s9 = inlined_call_operand.vmem [shape: f32[256,8], index: 9, kind: output, shape index: {}]  }
   0x1   :  { %v64_v0 = vld [vmem:[%s2254_s1] sm:$0xff]  ;;  %v49_v5 = vld [vmem:[%s2255_s0 + $0x88] sm:$0xff]  ;;  %v626_v6 = vld [vmem:[%s2256_s3 + $0xf8] sm:$0xff] }
   0x2   :  { %72 = vst [vmem:[#allocation1] ss:$2 sm:$0xff] %v64_v0  ;;  %v32_v1 = vld [vmem:[%s2255_s0] sm:$0xff]  ;;  %v610_v7 = vld [vmem:[%s2256_s3 + $0x78] sm:$0xff]  ;;  %v625_v8 = vld [vmem:[%s2256_s3 + $0xf0] sm:$0xff] }
   0x3   :  { %v1499_v4 = vld [vmem:[%s2255_s0 + $0x80] sm:$0xff]  ;;  %v609_v9 = vld [vmem:[%s2256_s3 + $0x70] sm:$0xff]  ;;  %v624_v10 = vld [vmem:[%s2256_s3 + $0xe8] sm:$0xff] }
   0x4   :  { %v608_v11 = vld [vmem:[%s2256_s3 + $0x68] sm:$0xff]  ;;  %v623_v13 = vld [vmem:[%s2256_s3 + $0xe0] sm:$0xff]  ;;  %v50_v15 = vld [vmem:[%s2255_s0 + $0x90] sm:$0xff] }
   0x5   :  { %v33_v12 = vld [vmem:[%s2255_s0 + $0x8] sm:$0xff]  ;;  %v607_v14 = vld [vmem:[%s2256_s3 + $0x60] sm:$0xff]  ;;  %v622_v16 = vld [vmem:[%s2256_s3 + $0xd8] sm:$0xff] }
   0x6   :  { %v606_v17 = vld [vmem:[%s2256_s3 + $0x58] sm:$0xff]  ;;  %v621_v18 = vld [vmem:[%s2256_s3 + $0xd0] sm:$0xff]  ;;  %v620_v22 = vld [vmem:[%s2256_s3 + $0xc8] sm:$0xff] }
   0x7   :  { %v34_v19 = vld [vmem:[%s2255_s0 + $0x10] sm:$0xff]  ;;  %v51_v20 = vld [vmem:[%s2255_s0 + $0x98] sm:$0xff]  ;;  %v52_v24 = vld [vmem:[%s2255_s0 + $0xa0] sm:$0xff] }
   0x8   :  { %v605_v21 = vld [vmem:[%s2256_s3 + $0x50] sm:$0xff]  ;;  %v35_v23 = vld [vmem:[%s2255_s0 + $0x18] sm:$0xff]  ;;  %v604_v25 = vld [vmem:[%s2256_s3 + $0x48] sm:$0xff] }
   0x9   :  { %v73_v2 = vld.sshfl [vmem:[#allocation1] sm:$0xff pattern:$0x75316420]  ;;  %v74_v3 = vld.sshfl [vmem:[#allocation1 + $0x8] sm:$0xff pattern:$0x75316420] }
   0xa   :  { %1352 = vmatpush.msk.msra.mxu0 %vm172_vm0, %v73_v2  ;;  %1385 = vmatpush.msk.msra.mxu1 %vm172_vm0, %v74_v3  ;;  %v619_v26 = vld [vmem:[%s2256_s3 + $0xc0] sm:$0xff]  ;;  %v53_v28 = vld [vmem:[%s2255_s0 + $0xa8] sm:$0xff]  ;;  %v618_v30 = vld [vmem:[%s2256_s3 + $0xb8] sm:$0xff] }
   0xb   :  { %1353 = vmatmul.msk.f32.vlgmr.msra.gmra.mxu0 %vm75_vm1, %v32_v1  ;;  %1386 = vmatmul.msk.f32.vlgmr.msra.gmra.mxu1 %vm75_vm1, %v32_v1  ;;  %v36_v27 = vld [vmem:[%s2255_s0 + $0x20] sm:$0xff]  ;;  %v602_v31 = vld [vmem:[%s2256_s3 + $0x38] sm:$0xff]  ;;  %v37_v32 = vld [vmem:[%s2255_s0 + $0x28] sm:$0xff] }
   0xc   :  { %1419 = vmatpush.msk.msra.mxu3 %vm172_vm0, %v74_v3  ;;  %1418 = vmatpush.msk.msra.mxu2 %vm172_vm0, %v73_v2  ;;  %v603_v29 = vld [vmem:[%s2256_s3 + $0x40] sm:$0xff]  ;;  %v54_v33 = vld [vmem:[%s2255_s0 + $0xb0] sm:$0xff]  ;;  %v55_v37 = vld [vmem:[%s2255_s0 + $0xb8] sm:$0xff] }
   0xd   :  { %1402 = vmatmul.msk.f32.vlgmr.msra.gmra.mxu3 %vm75_vm1, %v1499_v4  ;;  %1370 = vmatmul.msk.f32.vlgmr.msra.gmra.mxu2 %vm75_vm1, %v49_v5  ;;  %v617_v34 = vld [vmem:[%s2256_s3 + $0xb0] sm:$0xff]  ;;  %v616_v38 = vld [vmem:[%s2256_s3 + $0xa8] sm:$0xff]  ;;  %v39_v40 = vld [vmem:[%s2255_s0 + $0x38] sm:$0xff] }
   0xe   :  { %744 = vmatpush.msrb.mxu3 %v626_v6  ;;  %631 = vmatpush.msrb.mxu2 %v610_v7  ;;  %v601_v35 = vld [vmem:[%s2256_s3 + $0x30] sm:$0xff]  ;;  %v600_v39 = vld [vmem:[%s2256_s3 + $0x28] sm:$0xff]  ;;  %v56_v41 = vld [vmem:[%s2255_s0 + $0xc0] sm:$0xff] }
   0xf   :  { %v38_v36 = vld [vmem:[%s2255_s0 + $0x30] sm:$0xff]  ;;  %v615_v42 = vld [vmem:[%s2256_s3 + $0xa0] sm:$0xff]  ;;  %v57_v45 = vld [vmem:[%s2255_s0 + $0xc8] sm:$0xff] }
  0x10   :  { %745 = vmatpush.msrb.mxu3 %v625_v8  ;;  %632 = vmatpush.msrb.mxu2 %v609_v9  ;;  %v599_v43 = vld [vmem:[%s2256_s3 + $0x20] sm:$0xff]  ;;  %v598_v46 = vld [vmem:[%s2256_s3 + $0x18] sm:$0xff]  ;;  %v41_v48 = vld [vmem:[%s2255_s0 + $0x48] sm:$0xff] }
  0x11   :  { %v40_v44 = vld [vmem:[%s2255_s0 + $0x40] sm:$0xff]  ;;  %v614_v47 = vld [vmem:[%s2256_s3 + $0x98] sm:$0xff]  ;;  %v58_v49 = vld [vmem:[%s2255_s0 + $0xd0] sm:$0xff] }
  0x12   :  { %746 = vmatpush.msrb.mxu3 %v624_v10  ;;  %633 = vmatpush.msrb.mxu2 %v608_v11  ;;  %v597_v50 = vld [vmem:[%s2256_s3 + $0x10] sm:$0xff]  ;;  %v59_v53 = vld [vmem:[%s2255_s0 + $0xd8] sm:$0xff]  ;;  %v596_v54 = vld [vmem:[%s2256_s3 + $0x8] sm:$0xff] }
  0x13   :  { %1354 = vmatmul.msk.f32.gmra.mxu0 %vm75_vm1, %v33_v12  ;;  %1387 = vmatmul.msk.f32.gmra.mxu1 %vm75_vm1, %v33_v12  ;;  %v613_v51 = vld [vmem:[%s2256_s3 + $0x90] sm:$0xff]  ;;  %v612_v55 = vld [vmem:[%s2256_s3 + $0x88] sm:$0xff]  ;;  %v43_v56 = vld [vmem:[%s2255_s0 + $0x58] sm:$0xff] }
  0x14   :  { %747 = vmatpush.msrb.mxu3 %v623_v13  ;;  %634 = vmatpush.msrb.mxu2 %v607_v14  ;;  %v42_v52 = vld [vmem:[%s2255_s0 + $0x50] sm:$0xff]  ;;  %v60_v57 = vld [vmem:[%s2255_s0 + $0xe0] sm:$0xff]  ;;  %v61_v61 = vld [vmem:[%s2255_s0 + $0xe8] sm:$0xff] }
  0x15   :  { %1403 = vmatmul.msk.f32.gmra.mxu3 %vm75_vm1, %v49_v5  ;;  %1371 = vmatmul.msk.f32.gmra.mxu2 %vm75_vm1, %v50_v15  ;;  %v595_v58 = vld [vmem:[%s2256_s3] sm:$0xff]  ;;  %v45_v62 = vld [vmem:[%s2255_s0 + $0x68] sm:$0xff]  ;;  %v62_v63 = vld [vmem:[%s2255_s0 + $0xf0] sm:$0xff] }
  0x16   :  { %748 = vmatpush.msrb.mxu3 %v622_v16  ;;  %635 = vmatpush.msrb.mxu2 %v606_v17  ;;  %v44_v59 = vld [vmem:[%s2255_s0 + $0x60] sm:$0xff]  ;;  %v968_v0 = vld [vmem:[%s2257_s5 + $0x78] sm:$0xff]  ;;  %v46_v1 = vld [vmem:[%s2255_s0 + $0x70] sm:$0xff] }
  0x17   :  { %v611_v60 = vld [vmem:[%s2256_s3 + $0x80] sm:$0xff]  ;;  %973 = vmatpush.msrb.mxu0 %v968_v0  ;;  %v63_v2 = vld [vmem:[%s2255_s0 + $0xf8] sm:$0xff]  ;;  %v967_v5 = vld [vmem:[%s2257_s5 + $0x70] sm:$0xff] }
  0x18   :  { %749 = vmatpush.msrb.mxu3 %v621_v18  ;;  %636 = vmatpush.msrb.mxu2 %v605_v21  ;;  %v47_v3 = vld [vmem:[%s2255_s0 + $0x78] sm:$0xff]  ;;  %v65_v6 = vld [vmem:[%s2258_s2] sm:$0x3]  ;;  %v966_v13 = vld [vmem:[%s2257_s5 + $0x68] sm:$0xff] }
  0x19   :  { %974 = vmatpush.msrb.mxu0 %v967_v5  ;;  %v1760_v7 = vperm.slane %v65_v6, 0  ;;  %v1762_v8 = vperm.slane %v65_v6, 1 }
  0x1a   :  { %750 = vmatpush.msrb.mxu3 %v620_v22  ;;  %637 = vmatpush.msrb.mxu2 %v604_v25 }
  0x1b   :  { %1355 = vmatmul.msk.f32.gmra.mxu0 %vm75_vm1, %v34_v19  ;;  %1388 = vmatmul.msk.f32.gmra.mxu1 %vm75_vm1, %v34_v19 }
  0x1c   :  { %751 = vmatpush.msrb.mxu3 %v619_v26  ;;  %638 = vmatpush.msrb.mxu2 %v603_v29 }
  0x1d   :  { %1404 = vmatmul.msk.f32.gmra.mxu3 %vm75_vm1, %v50_v15  ;;  %1372 = vmatmul.msk.f32.gmra.mxu2 %vm75_vm1, %v51_v20 }
  0x1e   :  { %752 = vmatpush.msrb.mxu3 %v618_v30  ;;  %639 = vmatpush.msrb.mxu2 %v602_v31 }
  0x1f   :  { %975 = vmatpush.msrb.mxu0 %v966_v13 }
  0x20   :  { %753 = vmatpush.msrb.mxu3 %v617_v34  ;;  %640 = vmatpush.msrb.mxu2 %v601_v35  ;;  %v964_v34 = vld [vmem:[%s2257_s5 + $0x58] sm:$0xff] }
  0x22   :  { %754 = vmatpush.msrb.mxu3 %v616_v38  ;;  %641 = vmatpush.msrb.mxu2 %v600_v39 }
  0x23   :  { %1356 = vmatmul.msk.f32.gmra.mxu0 %vm75_vm1, %v35_v23  ;;  %1389 = vmatmul.msk.f32.gmra.mxu1 %vm75_vm1, %v35_v23 }
  0x24   :  { %755 = vmatpush.msrb.mxu3 %v615_v42  ;;  %642 = vmatpush.msrb.mxu2 %v599_v43 }
  0x25   :  { %1405 = vmatmul.msk.f32.gmra.mxu3 %vm75_vm1, %v51_v20  ;;  %1373 = vmatmul.msk.f32.gmra.mxu2 %vm75_vm1, %v52_v24 }
  0x26   :  { %643 = vmatpush.msrb.mxu2 %v598_v46  ;;  %756 = vmatpush.msrb.mxu3 %v614_v47 }
  0x28   :  { %644 = vmatpush.msrb.mxu2 %v597_v50  ;;  %757 = vmatpush.msrb.mxu3 %v613_v51 }
  0x2a   :  { %645 = vmatpush.msrb.mxu2 %v596_v54  ;;  %758 = vmatpush.msrb.mxu3 %v612_v55 }
  0x2b   :  { %1357 = vmatmul.msk.f32.gmra.mxu0 %vm75_vm1, %v36_v27  ;;  %1390 = vmatmul.msk.f32.gmra.mxu1 %vm75_vm1, %v36_v27 }
  0x2c   :  { %646 = vmatpush.msrb.mxu2 %v595_v58  ;;  %759 = vmatpush.msrb.mxu3 %v611_v60 }
  0x2d   :  { %1406 = vmatmul.msk.f32.gmra.mxu3 %vm75_vm1, %v52_v24  ;;  %1374 = vmatmul.msk.f32.gmra.mxu2 %vm75_vm1, %v53_v28 }
  0x2e   :  { %1420 = vmatpush.msra.mxu2 %v968_v0 }
  0x30   :  { %1421 = vmatpush.msra.mxu2 %v967_v5 }
  0x32   :  { %1422 = vmatpush.msra.mxu2 %v966_v13 }
  0x33   :  { %1358 = vmatmul.msk.f32.gmra.mxu0 %vm75_vm1, %v37_v32  ;;  %1391 = vmatmul.msk.f32.gmra.mxu1 %vm75_vm1, %v37_v32 }
  0x35   :  { %1407 = vmatmul.msk.f32.gmra.mxu3 %vm75_vm1, %v53_v28  ;;  %1375 = vmatmul.msk.f32.gmra.mxu2 %vm75_vm1, %v54_v33 }
  0x3b   :  { %1359 = vmatmul.msk.f32.gmra.mxu0 %vm75_vm1, %v38_v36  ;;  %1392 = vmatmul.msk.f32.gmra.mxu1 %vm75_vm1, %v38_v36 }
  0x3d   :  { %1408 = vmatmul.msk.f32.gmra.mxu3 %vm75_vm1, %v54_v33  ;;  %1376 = vmatmul.msk.f32.gmra.mxu2 %vm75_vm1, %v55_v37 }
  0x43   :  { %1360 = vmatmul.msk.f32.gmra.mxu0 %vm75_vm1, %v39_v40  ;;  %1393 = vmatmul.msk.f32.gmra.mxu1 %vm75_vm1, %v39_v40 }
  0x45   :  { %1409 = vmatmul.msk.f32.gmra.mxu3 %vm75_vm1, %v55_v37  ;;  %1377 = vmatmul.msk.f32.gmra.mxu2 %vm75_vm1, %v56_v41 }
  0x4b   :  { %1361 = vmatmul.msk.f32.gmra.mxu0 %vm75_vm1, %v40_v44  ;;  %1394 = vmatmul.msk.f32.gmra.mxu1 %vm75_vm1, %v40_v44 }
  0x4d   :  { %1410 = vmatmul.msk.f32.gmra.mxu3 %vm75_vm1, %v56_v41  ;;  %1378 = vmatmul.msk.f32.gmra.mxu2 %vm75_vm1, %v57_v45 }
  0x53   :  { %1362 = vmatmul.msk.f32.gmra.mxu0 %vm75_vm1, %v41_v48  ;;  %1395 = vmatmul.msk.f32.gmra.mxu1 %vm75_vm1, %v41_v48 }
  0x55   :  { %1411 = vmatmul.msk.f32.gmra.mxu3 %vm75_vm1, %v57_v45  ;;  %1379 = vmatmul.msk.f32.gmra.mxu2 %vm75_vm1, %v58_v49  ;;  %v963_v45 = vld [vmem:[%s2257_s5 + $0x50] sm:$0xff] }
  0x5b   :  { %1363 = vmatmul.msk.f32.gmra.mxu0 %vm75_vm1, %v42_v52  ;;  %1396 = vmatmul.msk.f32.gmra.mxu1 %vm75_vm1, %v42_v52 }
  0x5d   :  { %1412 = vmatmul.msk.f32.gmra.mxu3 %vm75_vm1, %v58_v49  ;;  %1380 = vmatmul.msk.f32.gmra.mxu2 %vm75_vm1, %v59_v53 }
  0x63   :  { %1364 = vmatmul.msk.f32.gmra.mxu0 %vm75_vm1, %v43_v56  ;;  %1397 = vmatmul.msk.f32.gmra.mxu1 %vm75_vm1, %v43_v56  ;;  %v962_v56 = vld [vmem:[%s2257_s5 + $0x48] sm:$0xff] }
  0x65   :  { %1413 = vmatmul.msk.f32.gmra.mxu3 %vm75_vm1, %v59_v53  ;;  %1381 = vmatmul.msk.f32.gmra.mxu2 %vm75_vm1, %v60_v57 }
  0x6b   :  { %1365 = vmatmul.msk.f32.gmra.mxu0 %vm75_vm1, %v44_v59  ;;  %1398 = vmatmul.msk.f32.gmra.mxu1 %vm75_vm1, %v44_v59 }
  0x6d   :  { %1414 = vmatmul.msk.f32.gmra.mxu3 %vm75_vm1, %v60_v57  ;;  %1382 = vmatmul.msk.f32.gmra.mxu2 %vm75_vm1, %v61_v61 }
  0x73   :  { %1366 = vmatmul.msk.f32.gmra.mxu0 %vm75_vm1, %v45_v62  ;;  %1399 = vmatmul.msk.f32.gmra.mxu1 %vm75_vm1, %v45_v62 }
  0x75   :  { %1415 = vmatmul.msk.f32.gmra.mxu3 %vm75_vm1, %v61_v61  ;;  %1383 = vmatmul.msk.f32.gmra.mxu2 %vm75_vm1, %v62_v63 }
  0x7b   :  { %1367 = vmatmul.msk.f32.gmra.mxu0 %vm75_vm1, %v46_v1  ;;  %1400 = vmatmul.msk.f32.gmra.mxu1 %vm75_vm1, %v46_v1 }
  0x7d   :  { %1416 = vmatmul.msk.f32.gmra.mxu3 %vm75_vm1, %v62_v63  ;;  %1384 = vmatmul.msk.f32.gmra.mxu2 %vm75_vm1, %v63_v2 }
  0x83   :  { %1368 = vmatmul.msk.f32.gmra.mxu0 %vm75_vm1, %v47_v3  ;;  %1401 = vmatmul.msk.f32.gmra.mxu1 %vm75_vm1, %v47_v3  ;;  %v961_v3 = vld [vmem:[%s2257_s5 + $0x40] sm:$0xff] }
  0x85   :  { %1417 = vmatmul.msk.f32.gmra.mxu3 %vm75_vm1, %v63_v2 }
  0x88   :  { %v194_v9 = vpop.f32.mrf.mxu0  ;;  %v307_v10 = vpop.f32.mrf.mxu1 }
  0x89   :  { %v195_v11 = vadd.f32 %v194_v9, %v1760_v7  ;;  %v308_v12 = vadd.f32 %v307_v10, %v1762_v8 }
  0x8b   :  { %1369 = vmatmul.msk.f32.gmra.mxu0 %vm75_vm1, %v1499_v4  ;;  %vm403_vm2 = vcmp.gt.f32.partialorder %v195_v11, 0.0  ;;  %v467_v14 = vmul.f32 0.1, %v195_v11  ;;  %vm404_vm3 = vcmp.gt.f32.partialorder %v308_v12, 0.0  ;;  %v468_v15 = vmul.f32 0.1, %v308_v12 }
  0x8c   :  { %v965_v4 = vld [vmem:[%s2257_s5 + $0x60] sm:$0xff] }
  0x8d   :  { %v531_v16 = vsel %vm403_vm2, %v195_v11, %v467_v14  ;;  %v532_v17 = vsel %vm404_vm3, %v308_v12, %v468_v15  ;;  %976 = vmatpush.msrb.mxu0 %v965_v4  ;;  %1423 = vmatpush.msra.mxu2 %v965_v4 }
  0x8e   :  { %647 = vmatmul.f32.vlgmr.msrb.gmra.mxu2 %v531_v16  ;;  %760 = vmatmul.f32.vlgmr.msrb.gmra.mxu3 %v532_v17  ;;  %v960_v17 = vld [vmem:[%s2257_s5 + $0x38] sm:$0xff] }
  0x8f   :  { %977 = vmatpush.msrb.mxu0 %v964_v34  ;;  %1424 = vmatpush.msra.mxu2 %v964_v34 }
  0x90   :  { %v197_v18 = vpop.f32.mrf.mxu0  ;;  %v310_v19 = vpop.f32.mrf.mxu1 }
  0x91   :  { %v198_v20 = vadd.f32 %v197_v18, %v1760_v7  ;;  %v311_v21 = vadd.f32 %v310_v19, %v1762_v8  ;;  %v1773_v22 = vpop.f32.mrf.mxu3  ;;  %v1775_v23 = vpop.f32.mrf.mxu2  ;;  %978 = vmatpush.msrb.mxu0 %v963_v45  ;;  %1425 = vmatpush.msra.mxu2 %v963_v45 }
  0x93   :  { %vm405_vm4 = vcmp.gt.f32.partialorder %v198_v20, 0.0  ;;  %v469_v24 = vmul.f32 0.1, %v198_v20  ;;  %vm406_vm5 = vcmp.gt.f32.partialorder %v311_v21, 0.0  ;;  %v470_v25 = vmul.f32 0.1, %v311_v21  ;;  %979 = vmatpush.msrb.mxu0 %v962_v56  ;;  %1426 = vmatpush.msra.mxu2 %v962_v56 }
  0x95   :  { %v533_v26 = vsel %vm405_vm4, %v198_v20, %v469_v24  ;;  %v534_v27 = vsel %vm406_vm5, %v311_v21, %v470_v25  ;;  %980 = vmatpush.msrb.mxu0 %v961_v3  ;;  %1427 = vmatpush.msra.mxu2 %v961_v3 }
  0x96   :  { %650 = vmatmul.f32.gmra.mxu2 %v533_v26  ;;  %763 = vmatmul.f32.gmra.mxu3 %v534_v27 }
  0x97   :  { %981 = vmatpush.msrb.mxu0 %v960_v17  ;;  %1428 = vmatpush.msra.mxu2 %v960_v17 }
  0x98   :  { %v200_v28 = vpop.f32.mrf.mxu0  ;;  %v313_v29 = vpop.f32.mrf.mxu1 }
  0x99   :  { %v201_v30 = vadd.f32 %v200_v28, %v1760_v7  ;;  %v314_v31 = vadd.f32 %v313_v29, %v1762_v8  ;;  %v1782_v32 = vpop.f32.mrf.mxu3  ;;  %v1784_v33 = vpop.f32.mrf.mxu2  ;;  %v959_v29 = vld [vmem:[%s2257_s5 + $0x30] sm:$0xff] }
  0x9a   :  { %982 = vmatpush.msrb.mxu0 %v959_v29  ;;  %1429 = vmatpush.msra.mxu2 %v959_v29  ;;  %v955_v29 = vld [vmem:[%s2257_s5 + $0x10] sm:$0xff] }
  0x9b   :  { %vm407_vm6 = vcmp.gt.f32.partialorder %v201_v30, 0.0  ;;  %v471_v35 = vmul.f32 0.1, %v201_v30  ;;  %vm408_vm7 = vcmp.gt.f32.partialorder %v314_v31, 0.0  ;;  %v472_v36 = vmul.f32 0.1, %v314_v31 }
  0x9d   :  { %v535_v37 = vsel %vm407_vm6, %v201_v30, %v471_v35  ;;  %v536_v38 = vsel %vm408_vm7, %v314_v31, %v472_v36 }
  0x9e   :  { %653 = vmatmul.f32.gmra.mxu2 %v535_v37  ;;  %766 = vmatmul.f32.gmra.mxu3 %v536_v38 }
  0xa0   :  { %v203_v39 = vpop.f32.mrf.mxu0  ;;  %v316_v40 = vpop.f32.mrf.mxu1 }
  0xa1   :  { %v204_v41 = vadd.f32 %v203_v39, %v1760_v7  ;;  %v317_v42 = vadd.f32 %v316_v40, %v1762_v8  ;;  %v1791_v43 = vpop.f32.mrf.mxu3  ;;  %v1793_v44 = vpop.f32.mrf.mxu2 }
  0xa3   :  { %vm409_vm8 = vcmp.gt.f32.partialorder %v204_v41, 0.0  ;;  %v473_v46 = vmul.f32 0.1, %v204_v41  ;;  %vm410_vm9 = vcmp.gt.f32.partialorder %v317_v42, 0.0  ;;  %v474_v47 = vmul.f32 0.1, %v317_v42 }
  0xa5   :  { %v537_v48 = vsel %vm409_vm8, %v204_v41, %v473_v46  ;;  %v538_v49 = vsel %vm410_vm9, %v317_v42, %v474_v47  ;;  %v958_v42 = vld [vmem:[%s2257_s5 + $0x28] sm:$0xff] }
  0xa6   :  { %656 = vmatmul.f32.gmra.mxu2 %v537_v48  ;;  %769 = vmatmul.f32.gmra.mxu3 %v538_v49 }
  0xa7   :  { %983 = vmatpush.msrb.mxu0 %v958_v42  ;;  %1430 = vmatpush.msra.mxu2 %v958_v42 }
  0xa8   :  { %v206_v50 = vpop.f32.mrf.mxu0  ;;  %v319_v51 = vpop.f32.mrf.mxu1 }
  0xa9   :  { %v207_v52 = vadd.f32 %v206_v50, %v1760_v7  ;;  %v320_v53 = vadd.f32 %v319_v51, %v1762_v8  ;;  %v1800_v54 = vpop.f32.mrf.mxu3  ;;  %v1802_v55 = vpop.f32.mrf.mxu2 }
  0xab   :  { %vm411_vm10 = vcmp.gt.f32.partialorder %v207_v52, 0.0  ;;  %v475_v57 = vmul.f32 0.1, %v207_v52  ;;  %vm412_vm11 = vcmp.gt.f32.partialorder %v320_v53, 0.0  ;;  %v476_v58 = vmul.f32 0.1, %v320_v53 }
  0xad   :  { %v539_v59 = vsel %vm411_vm10, %v207_v52, %v475_v57  ;;  %v540_v60 = vsel %vm412_vm11, %v320_v53, %v476_v58  ;;  %v957_v57 = vld [vmem:[%s2257_s5 + $0x20] sm:$0xff] }
  0xae   :  { %659 = vmatmul.f32.gmra.mxu2 %v539_v59  ;;  %772 = vmatmul.f32.gmra.mxu3 %v540_v60 }
  0xaf   :  { %984 = vmatpush.msrb.mxu0 %v957_v57  ;;  %1431 = vmatpush.msra.mxu2 %v957_v57 }
  0xb0   :  { %v209_v61 = vpop.f32.mrf.mxu0  ;;  %v322_v62 = vpop.f32.mrf.mxu1 }
  0xb1   :  { %v210_v63 = vadd.f32 %v209_v61, %v1760_v7  ;;  %v323_v0 = vadd.f32 %v322_v62, %v1762_v8  ;;  %v1809_v1 = vpop.f32.mrf.mxu3  ;;  %v1811_v2 = vpop.f32.mrf.mxu2 }
  0xb3   :  { %vm413_vm12 = vcmp.gt.f32.partialorder %v210_v63, 0.0  ;;  %v477_v5 = vmul.f32 0.1, %v210_v63  ;;  %vm414_vm13 = vcmp.gt.f32.partialorder %v323_v0, 0.0  ;;  %v478_v6 = vmul.f32 0.1, %v323_v0 }
  0xb5   :  { %v541_v9 = vsel %vm413_vm12, %v210_v63, %v477_v5  ;;  %v542_v10 = vsel %vm414_vm13, %v323_v0, %v478_v6 }
  0xb6   :  { %662 = vmatmul.f32.gmra.mxu2 %v541_v9  ;;  %775 = vmatmul.f32.gmra.mxu3 %v542_v10  ;;  %v956_v9 = vld [vmem:[%s2257_s5 + $0x18] sm:$0xff] }
  0xb7   :  { %985 = vmatpush.msrb.mxu0 %v956_v9  ;;  %1432 = vmatpush.msra.mxu2 %v956_v9 }
  0xb8   :  { %v212_v11 = vpop.f32.mrf.mxu0  ;;  %v325_v12 = vpop.f32.mrf.mxu1 }
  0xb9   :  { %v213_v13 = vadd.f32 %v212_v11, %v1760_v7  ;;  %v326_v14 = vadd.f32 %v325_v12, %v1762_v8  ;;  %v1818_v15 = vpop.f32.mrf.mxu3  ;;  %v1820_v16 = vpop.f32.mrf.mxu2  ;;  %986 = vmatpush.msrb.mxu0 %v955_v29  ;;  %1433 = vmatpush.msra.mxu2 %v955_v29  ;;  %v1197_v29 = vld [vmem:[%s2260_s7 + $0x78] sm:$0xff] }
  0xba   :  { %1202 = vmatpush.msrb.mxu1 %v1197_v29 }
  0xbb   :  { %vm415_vm14 = vcmp.gt.f32.partialorder %v213_v13, 0.0  ;;  %v479_v18 = vmul.f32 0.1, %v213_v13  ;;  %vm416_vm15 = vcmp.gt.f32.partialorder %v326_v14, 0.0  ;;  %v480_v19 = vmul.f32 0.1, %v326_v14 }
  0xbd   :  { %v543_v20 = vsel %vm415_vm14, %v213_v13, %v479_v18  ;;  %v544_v21 = vsel %vm416_vm15, %v326_v14, %v480_v19 }
  0xbe   :  { %665 = vmatmul.f32.gmra.mxu2 %v543_v20  ;;  %778 = vmatmul.f32.gmra.mxu3 %v544_v21 }
  0xc0   :  { %v215_v4 = vpop.f32.mrf.mxu0  ;;  %v328_v24 = vpop.f32.mrf.mxu1 }
  0xc1   :  { %v216_v25 = vadd.f32 %v215_v4, %v1760_v7  ;;  %v329_v26 = vadd.f32 %v328_v24, %v1762_v8  ;;  %v1827_v27 = vpop.f32.mrf.mxu3  ;;  %v1829_v28 = vpop.f32.mrf.mxu2 }
  0xc3   :  { %vm417_vm0 = vcmp.gt.f32.partialorder %v216_v25, 0.0  ;;  %v481_v30 = vmul.f32 0.1, %v216_v25  ;;  %vm418_vm1 = vcmp.gt.f32.partialorder %v329_v26, 0.0  ;;  %v482_v31 = vmul.f32 0.1, %v329_v26 }
  0xc5   :  { %v545_v34 = vsel %vm417_vm0, %v216_v25, %v481_v30  ;;  %v546_v35 = vsel %vm418_vm1, %v329_v26, %v482_v31 }
  0xc6   :  { %668 = vmatmul.f32.gmra.mxu2 %v545_v34  ;;  %781 = vmatmul.f32.gmra.mxu3 %v546_v35 }
  0xc8   :  { %v218_v36 = vpop.f32.mrf.mxu0  ;;  %v331_v37 = vpop.f32.mrf.mxu1 }
  0xc9   :  { %v219_v38 = vadd.f32 %v218_v36, %v1760_v7  ;;  %v332_v39 = vadd.f32 %v331_v37, %v1762_v8  ;;  %v1836_v40 = vpop.f32.mrf.mxu3  ;;  %v1838_v41 = vpop.f32.mrf.mxu2 }
  0xcb   :  { %vm419_vm2 = vcmp.gt.f32.partialorder %v219_v38, 0.0  ;;  %v483_v45 = vmul.f32 0.1, %v219_v38  ;;  %vm420_vm3 = vcmp.gt.f32.partialorder %v332_v39, 0.0  ;;  %v484_v46 = vmul.f32 0.1, %v332_v39 }
  0xcd   :  { %v547_v47 = vsel %vm419_vm2, %v219_v38, %v483_v45  ;;  %v548_v48 = vsel %vm420_vm3, %v332_v39, %v484_v46  ;;  %v954_v46 = vld [vmem:[%s2257_s5 + $0x8] sm:$0xff] }
  0xce   :  { %671 = vmatmul.f32.gmra.mxu2 %v547_v47  ;;  %784 = vmatmul.f32.gmra.mxu3 %v548_v48 }
  0xcf   :  { %987 = vmatpush.msrb.mxu0 %v954_v46  ;;  %1434 = vmatpush.msra.mxu2 %v954_v46 }
  0xd0   :  { %v221_v49 = vpop.f32.mrf.mxu0  ;;  %v334_v50 = vpop.f32.mrf.mxu1 }
  0xd1   :  { %v222_v51 = vadd.f32 %v221_v49, %v1760_v7  ;;  %v335_v52 = vadd.f32 %v334_v50, %v1762_v8  ;;  %v1845_v53 = vpop.f32.mrf.mxu3  ;;  %v1847_v56 = vpop.f32.mrf.mxu2 }
  0xd3   :  { %vm421_vm4 = vcmp.gt.f32.partialorder %v222_v51, 0.0  ;;  %v485_v58 = vmul.f32 0.1, %v222_v51  ;;  %vm422_vm5 = vcmp.gt.f32.partialorder %v335_v52, 0.0  ;;  %v486_v59 = vmul.f32 0.1, %v335_v52 }
  0xd5   :  { %v549_v60 = vsel %vm421_vm4, %v222_v51, %v485_v58  ;;  %v550_v61 = vsel %vm422_vm5, %v335_v52, %v486_v59 }
  0xd6   :  { %674 = vmatmul.f32.gmra.mxu2 %v549_v60  ;;  %787 = vmatmul.f32.gmra.mxu3 %v550_v61  ;;  %v953_v61 = vld [vmem:[%s2257_s5] sm:$0xff] }
  0xd7   :  { %988 = vmatpush.msrb.mxu0 %v953_v61  ;;  %1435 = vmatpush.msra.mxu2 %v953_v61 }
  0xd8   :  { %v224_v62 = vpop.f32.mrf.mxu0  ;;  %v337_v63 = vpop.f32.mrf.mxu1 }
  0xd9   :  { %v225_v0 = vadd.f32 %v224_v62, %v1760_v7  ;;  %v338_v3 = vadd.f32 %v337_v63, %v1762_v8  ;;  %v1854_v5 = vpop.f32.mrf.mxu3  ;;  %v1856_v6 = vpop.f32.mrf.mxu2 }
  0xdb   :  { %vm423_vm6 = vcmp.gt.f32.partialorder %v225_v0, 0.0  ;;  %v487_v10 = vmul.f32 0.1, %v225_v0  ;;  %vm424_vm7 = vcmp.gt.f32.partialorder %v338_v3, 0.0  ;;  %v488_v11 = vmul.f32 0.1, %v338_v3 }
  0xdd   :  { %v551_v12 = vsel %vm423_vm6, %v225_v0, %v487_v10  ;;  %v552_v13 = vsel %vm424_vm7, %v338_v3, %v488_v11 }
  0xde   :  { %677 = vmatmul.f32.gmra.mxu2 %v551_v12  ;;  %790 = vmatmul.f32.gmra.mxu3 %v552_v13 }
  0xe0   :  { %v227_v14 = vpop.f32.mrf.mxu0  ;;  %v340_v17 = vpop.f32.mrf.mxu1 }
  0xe1   :  { %v228_v18 = vadd.f32 %v227_v14, %v1760_v7  ;;  %v341_v19 = vadd.f32 %v340_v17, %v1762_v8  ;;  %v1863_v20 = vpop.f32.mrf.mxu3  ;;  %v1865_v21 = vpop.f32.mrf.mxu2 }
  0xe3   :  { %vm425_vm8 = vcmp.gt.f32.partialorder %v228_v18, 0.0  ;;  %v489_v4 = vmul.f32 0.1, %v228_v18  ;;  %vm426_vm9 = vcmp.gt.f32.partialorder %v341_v19, 0.0  ;;  %v490_v24 = vmul.f32 0.1, %v341_v19 }
  0xe5   :  { %v553_v25 = vsel %vm425_vm8, %v228_v18, %v489_v4  ;;  %v554_v26 = vsel %vm426_vm9, %v341_v19, %v490_v24 }
  0xe6   :  { %680 = vmatmul.f32.gmra.mxu2 %v553_v25  ;;  %793 = vmatmul.f32.gmra.mxu3 %v554_v26 }
  0xe8   :  { %v230_v30 = vpop.f32.mrf.mxu0  ;;  %v343_v31 = vpop.f32.mrf.mxu1 }
  0xe9   :  { %v231_v34 = vadd.f32 %v230_v30, %v1760_v7  ;;  %v344_v35 = vadd.f32 %v343_v31, %v1762_v8  ;;  %v1872_v36 = vpop.f32.mrf.mxu3  ;;  %v1874_v39 = vpop.f32.mrf.mxu2  ;;  %v356_v30 = vadd.f32 %v1773_v22, %v1762_v8  ;;  %v1196_v22 = vld [vmem:[%s2260_s7 + $0x70] sm:$0xff] }
  0xea   :  { %1203 = vmatpush.msrb.mxu1 %v1196_v22 }
  0xeb   :  { %vm427_vm10 = vcmp.gt.f32.partialorder %v231_v34, 0.0  ;;  %v491_v37 = vmul.f32 0.1, %v231_v34  ;;  %vm428_vm11 = vcmp.gt.f32.partialorder %v344_v35, 0.0  ;;  %v492_v38 = vmul.f32 0.1, %v344_v35 }
  0xec   :  { %vm436_vm2 = vcmp.gt.f32.partialorder %v356_v30, 0.0 }
  0xed   :  { %v555_v42 = vsel %vm427_vm10, %v231_v34, %v491_v37  ;;  %v556_v45 = vsel %vm428_vm11, %v344_v35, %v492_v38 }
  0xee   :  { %683 = vmatmul.f32.gmra.mxu2 %v555_v42  ;;  %796 = vmatmul.f32.gmra.mxu3 %v556_v45  ;;  %v500_v45 = vmul.f32 0.1, %v356_v30 }
  0xf0   :  { %v233_v47 = vpop.f32.mrf.mxu0  ;;  %v346_v48 = vpop.f32.mrf.mxu1 }
  0xf1   :  { %v234_v49 = vadd.f32 %v233_v47, %v1760_v7  ;;  %v347_v50 = vadd.f32 %v346_v48, %v1762_v8  ;;  %v1881_v51 = vpop.f32.mrf.mxu3  ;;  %v1883_v60 = vpop.f32.mrf.mxu2  ;;  %v246_v47 = vadd.f32 %v1775_v23, %v1760_v7  ;;  %v359_v48 = vadd.f32 %v1782_v32, %v1762_v8  ;;  %v1195_v32 = vld [vmem:[%s2260_s7 + $0x68] sm:$0xff] }
  0xf2   :  { %1204 = vmatpush.msrb.mxu1 %v1195_v32 }
  0xf3   :  { %vm429_vm12 = vcmp.gt.f32.partialorder %v234_v49, 0.0  ;;  %v493_v52 = vmul.f32 0.1, %v234_v49  ;;  %vm430_vm13 = vcmp.gt.f32.partialorder %v347_v50, 0.0  ;;  %v494_v57 = vmul.f32 0.1, %v347_v50 }
  0xf4   :  { %v502_v61 = vmul.f32 0.1, %v359_v48  ;;  %vm437_vm4 = vcmp.gt.f32.partialorder %v246_v47, 0.0  ;;  %vm438_vm5 = vcmp.gt.f32.partialorder %v359_v48, 0.0 }
  0xf5   :  { %v557_v58 = vsel %vm429_vm12, %v234_v49, %v493_v52  ;;  %v558_v59 = vsel %vm430_vm13, %v347_v50, %v494_v57  ;;  %v564_v50 = vsel %vm436_vm2, %v356_v30, %v500_v45  ;;  %v1918_v52 = vld [vmem:[%s2259_s4] ss:$0 sm:$0xff] }
  0xf6   :  { %686 = vmatmul.f32.gmra.mxu2 %v557_v58  ;;  %799 = vmatmul.f32.gmra.mxu3 %v558_v59  ;;  %v501_v59 = vmul.f32 0.1, %v246_v47 }
  0xf8   :  { %v236_v62 = vpop.f32.mrf.mxu0  ;;  %v349_v63 = vpop.f32.mrf.mxu1 }
  0xf9   :  { %v237_v0 = vadd.f32 %v236_v62, %v1760_v7  ;;  %v350_v3 = vadd.f32 %v349_v63, %v1762_v8  ;;  %v1890_v9 = vpop.f32.mrf.mxu3  ;;  %v1892_v14 = vpop.f32.mrf.mxu2  ;;  %v249_v63 = vadd.f32 %v1784_v33, %v1760_v7 }
  0xfb   :  { %vm431_vm14 = vcmp.gt.f32.partialorder %v237_v0, 0.0  ;;  %v495_v10 = vmul.f32 0.1, %v237_v0  ;;  %vm432_vm15 = vcmp.gt.f32.partialorder %v350_v3, 0.0  ;;  %v496_v11 = vmul.f32 0.1, %v350_v3 }
  0xfc   :  { %vm439_vm7 = vcmp.gt.f32.partialorder %v249_v63, 0.0 }
  0xfd   :  { %v559_v12 = vsel %vm431_vm14, %v237_v0, %v495_v10  ;;  %v560_v13 = vsel %vm432_vm15, %v350_v3, %v496_v11  ;;  %v362_v0 = vadd.f32 %v1791_v43, %v1762_v8  ;;  %v565_v3 = vsel %vm437_vm4, %v246_v47, %v501_v59  ;;  %v1194_v43 = vld [vmem:[%s2260_s7 + $0x60] sm:$0xff] }
  0xfe   :  { %689 = vmatmul.f32.gmra.mxu2 %v559_v12  ;;  %802 = vmatmul.f32.gmra.mxu3 %v560_v13  ;;  %v566_v10 = vsel %vm438_vm5, %v359_v48, %v502_v61  ;;  %v255_v47 = vadd.f32 %v1802_v55, %v1760_v7  ;;  %v368_v48 = vadd.f32 %v1809_v1, %v1762_v8  ;;  %v1192_v1 = vld [vmem:[%s2260_s7 + $0x50] sm:$0xff] }
  0xff   :  { %vm440_vm8 = vcmp.gt.f32.partialorder %v362_v0, 0.0  ;;  %1205 = vmatpush.msrb.mxu1 %v1194_v43 }
 0x100   :  { %v239_v17 = vpop.f32.mrf.mxu0  ;;  %v352_v18 = vpop.f32.mrf.mxu1  ;;  %vm443_vm13 = vcmp.gt.f32.partialorder %v255_v47, 0.0  ;;  %vm444_vm14 = vcmp.gt.f32.partialorder %v368_v48, 0.0 }
 0x101   :  { %v240_v19 = vadd.f32 %v239_v17, %v1760_v7  ;;  %v353_v4 = vadd.f32 %v352_v18, %v1762_v8  ;;  %v1896_v24 = vpop.f32.mrf.mxu3  ;;  %v1903_v37 = vpop.f32.mrf.mxu2  ;;  %v503_v18 = vmul.f32 0.1, %v249_v63 }
 0x103   :  { %vm433_vm0 = vcmp.gt.f32.partialorder %v240_v19, 0.0  ;;  %v497_v25 = vmul.f32 0.1, %v240_v19  ;;  %vm434_vm1 = vcmp.gt.f32.partialorder %v353_v4, 0.0  ;;  %v498_v26 = vmul.f32 0.1, %v353_v4 }
 0x104   :  { %v567_v29 = vsel %vm439_vm7, %v249_v63, %v503_v18  ;;  %v258_v63 = vadd.f32 %v1811_v2, %v1760_v7 }
 0x105   :  { %v561_v31 = vsel %vm433_vm0, %v240_v19, %v497_v25  ;;  %v562_v34 = vsel %vm434_vm1, %v353_v4, %v498_v26  ;;  %v504_v19 = vmul.f32 0.1, %v362_v0  ;;  %v252_v25 = vadd.f32 %v1793_v44, %v1760_v7 }
 0x106   :  { %692 = vmatmul.f32.gmra.mxu2 %v561_v31  ;;  %805 = vmatmul.f32.gmra.mxu3 %v562_v34  ;;  %v365_v26 = vadd.f32 %v1800_v54, %v1762_v8  ;;  %v1193_v54 = vld [vmem:[%s2260_s7 + $0x58] sm:$0xff]  ;;  %v509_v18 = vmul.f32 0.1, %v258_v63  ;;  %vm445_vm0 = vcmp.gt.f32.partialorder %v258_v63, 0.0 }
 0x107   :  { %v568_v30 = vsel %vm440_vm8, %v362_v0, %v504_v19  ;;  %v505_v45 = vmul.f32 0.1, %v252_v25  ;;  %vm441_vm10 = vcmp.gt.f32.partialorder %v252_v25, 0.0  ;;  %1206 = vmatpush.msrb.mxu1 %v1193_v54  ;;  %v371_v0 = vadd.f32 %v1818_v15, %v1762_v8 }
 0x108   :  { %v242_v35 = vpop.f32.mrf.mxu0  ;;  %vm442_vm11 = vcmp.gt.f32.partialorder %v365_v26, 0.0  ;;  %v261_v15 = vadd.f32 %v1820_v16, %v1760_v7  ;;  %v573_v43 = vsel %vm445_vm0, %v258_v63, %v509_v18 }
 0x109   :  { %v243_v38 = vadd.f32 %v242_v35, %v1760_v7  ;;  %v1906_v42 = vpop.f32.mrf.mxu3  ;;  %1207 = vmatpush.msrb.mxu1 %v1192_v1  ;;  %v510_v19 = vmul.f32 0.1, %v371_v0  ;;  %vm446_vm1 = vcmp.gt.f32.partialorder %v371_v0, 0.0 }
 0x10b   :  { %vm435_vm3 = vcmp.gt.f32.partialorder %v243_v38, 0.0  ;;  %v499_v46 = vmul.f32 0.1, %v243_v38 }
 0x10d   :  { %v563_v49 = vsel %vm435_vm3, %v243_v38, %v499_v46  ;;  %v506_v46 = vmul.f32 0.1, %v365_v26  ;;  %vm447_vm3 = vcmp.gt.f32.partialorder %v261_v15, 0.0 }
 0x10e   :  { %695 = vmatmul.f32.gmra.mxu2 %v563_v49  ;;  %808 = vmatmul.f32.gmra.mxu3 %v564_v50  ;;  %v569_v49 = vsel %vm441_vm10, %v252_v25, %v505_v45  ;;  %v574_v25 = vsel %vm446_vm1, %v371_v0, %v510_v19  ;;  %v264_v45 = vadd.f32 %v1829_v28, %v1760_v7  ;;  %v1188_v19 = vld [vmem:[%s2260_s7 + $0x30] sm:$0xff] }
 0x10f   :  { %v570_v50 = vsel %vm442_vm11, %v365_v26, %v506_v46  ;;  %v377_v46 = vadd.f32 %v1836_v40, %v1762_v8 }
 0x111   :  { %v648_v57 = vpop.f32.mrf.mxu2  ;;  %v761_v58 = vpop.f32.mrf.mxu3  ;;  %v514_v28 = vmul.f32 0.1, %v377_v46  ;;  %vm450_vm7 = vcmp.gt.f32.partialorder %v377_v46, 0.0 }
 0x112   :  { %v649_v62 = vadd.f32 %v1918_v52, %v648_v57 }
 0x114   :  { %v762_v23 = vadd.f32 %v761_v58, %v649_v62  ;;  %v507_v62 = vmul.f32 0.1, %v255_v47 }
 0x116   :  { %698 = vmatmul.f32.gmra.mxu2 %v565_v3  ;;  %811 = vmatmul.f32.gmra.mxu3 %v566_v10  ;;  %vm857_vm6 = vcmp.gt.f32.partialorder %v762_v23, 0.0  ;;  %v889_v11 = vmul.f32 0.1, %v762_v23  ;;  %v571_v3 = vsel %vm443_vm13, %v255_v47, %v507_v62  ;;  %v1190_v47 = vld [vmem:[%s2260_s7 + $0x40] sm:$0xff] }
 0x118   :  { %v921_v12 = vsel %vm857_vm6, %v762_v23, %v889_v11  ;;  %v508_v23 = vmul.f32 0.1, %v368_v48  ;;  %vm449_vm6 = vcmp.gt.f32.partialorder %v264_v45, 0.0 }
 0x119   :  { %v651_v13 = vpop.f32.mrf.mxu2  ;;  %v764_v17 = vpop.f32.mrf.mxu3  ;;  %989 = vmatmul.f32.vlgmr.msrb.gmra.mxu0 %v921_v12 }
 0x11a   :  { %v652_v4 = vadd.f32 %v1918_v52, %v651_v13  ;;  %v572_v10 = vsel %vm444_vm14, %v368_v48, %v508_v23  ;;  %v578_v23 = vsel %vm450_vm7, %v377_v46, %v514_v28  ;;  %v276_v46 = vadd.f32 %v1865_v21, %v1760_v7 }
 0x11c   :  { %v765_v33 = vadd.f32 %v764_v17, %v652_v4  ;;  %v521_v28 = vmul.f32 0.1, %v276_v46 }
 0x11e   :  { %701 = vmatmul.f32.gmra.mxu2 %v567_v29  ;;  %814 = vmatmul.f32.gmra.mxu3 %v568_v30  ;;  %vm858_vm9 = vcmp.gt.f32.partialorder %v765_v33, 0.0  ;;  %v890_v31 = vmul.f32 0.1, %v765_v33  ;;  %v1191_v29 = vld [vmem:[%s2260_s7 + $0x48] sm:$0xff] }
 0x11f   :  { %1208 = vmatpush.msrb.mxu1 %v1191_v29 }
 0x120   :  { %v922_v34 = vsel %vm858_vm9, %v765_v33, %v890_v31  ;;  %v374_v33 = vadd.f32 %v1827_v27, %v1762_v8 }
 0x121   :  { %v654_v35 = vpop.f32.mrf.mxu2  ;;  %v767_v38 = vpop.f32.mrf.mxu3  ;;  %992 = vmatmul.f32.gmra.mxu0 %v922_v34  ;;  %1209 = vmatpush.msrb.mxu1 %v1190_v47 }
 0x122   :  { %v655_v22 = vadd.f32 %v1918_v52, %v654_v35  ;;  %v511_v35 = vmul.f32 0.1, %v261_v15  ;;  %v512_v16 = vmul.f32 0.1, %v374_v33  ;;  %vm448_vm4 = vcmp.gt.f32.partialorder %v374_v33, 0.0 }
 0x124   :  { %v768_v44 = vadd.f32 %v767_v38, %v655_v22  ;;  %v575_v22 = vsel %vm447_vm3, %v261_v15, %v511_v35 }
 0x126   :  { %704 = vmatmul.f32.gmra.mxu2 %v569_v49  ;;  %817 = vmatmul.f32.gmra.mxu3 %v570_v50  ;;  %vm859_vm12 = vcmp.gt.f32.partialorder %v768_v44, 0.0  ;;  %v891_v57 = vmul.f32 0.1, %v768_v44 }
 0x128   :  { %v923_v58 = vsel %vm859_vm12, %v768_v44, %v891_v57  ;;  %v576_v44 = vsel %vm448_vm4, %v374_v33, %v512_v16  ;;  %v513_v57 = vmul.f32 0.1, %v264_v45 }
 0x129   :  { %v657_v59 = vpop.f32.mrf.mxu2  ;;  %v770_v61 = vpop.f32.mrf.mxu3  ;;  %995 = vmatmul.f32.gmra.mxu0 %v923_v58 }
 0x12a   :  { %v658_v32 = vadd.f32 %v1918_v52, %v657_v59  ;;  %v267_v59 = vadd.f32 %v1838_v41, %v1760_v7  ;;  %v577_v62 = vsel %vm449_vm6, %v264_v45, %v513_v57 }
 0x12c   :  { %v771_v55 = vadd.f32 %v770_v61, %v658_v32  ;;  %v380_v61 = vadd.f32 %v1845_v53, %v1762_v8  ;;  %vm451_vm9 = vcmp.gt.f32.partialorder %v267_v59, 0.0 }
 0x12e   :  { %707 = vmatmul.f32.gmra.mxu2 %v571_v3  ;;  %820 = vmatmul.f32.gmra.mxu3 %v572_v10  ;;  %vm860_vm15 = vcmp.gt.f32.partialorder %v771_v55, 0.0  ;;  %v892_v11 = vmul.f32 0.1, %v771_v55  ;;  %v515_v3 = vmul.f32 0.1, %v267_v59  ;;  %vm452_vm10 = vcmp.gt.f32.partialorder %v380_v61, 0.0 }
 0x12f   :  { %v516_v41 = vmul.f32 0.1, %v380_v61 }
 0x130   :  { %v924_v12 = vsel %vm860_vm15, %v771_v55, %v892_v11  ;;  %v1189_v55 = vld [vmem:[%s2260_s7 + $0x38] sm:$0xff]  ;;  %v270_v11 = vadd.f32 %v1847_v56, %v1760_v7 }
 0x131   :  { %v660_v13 = vpop.f32.mrf.mxu2  ;;  %v773_v17 = vpop.f32.mrf.mxu3  ;;  %998 = vmatmul.f32.gmra.mxu0 %v924_v12  ;;  %1210 = vmatpush.msrb.mxu1 %v1189_v55  ;;  %v383_v12 = vadd.f32 %v1854_v5, %v1762_v8 }
 0x132   :  { %v661_v4 = vadd.f32 %v1918_v52, %v660_v13  ;;  %v579_v13 = vsel %vm451_vm9, %v267_v59, %v515_v3  ;;  %v517_v33 = vmul.f32 0.1, %v270_v11  ;;  %vm453_vm12 = vcmp.gt.f32.partialorder %v270_v11, 0.0 }
 0x133   :  { %1211 = vmatpush.msrb.mxu1 %v1188_v19  ;;  %v518_v56 = vmul.f32 0.1, %v383_v12  ;;  %vm454_vm13 = vcmp.gt.f32.partialorder %v383_v12, 0.0  ;;  %v392_v59 = vadd.f32 %v1881_v51, %v1762_v8 }
 0x134   :  { %v774_v2 = vadd.f32 %v773_v17, %v661_v4  ;;  %v580_v17 = vsel %vm452_vm10, %v380_v61, %v516_v41  ;;  %v581_v29 = vsel %vm453_vm12, %v270_v11, %v517_v33  ;;  %v282_v41 = vadd.f32 %v1883_v60, %v1760_v7 }
 0x135   :  { %vm460_vm6 = vcmp.gt.f32.partialorder %v392_v59, 0.0  ;;  %v398_v33 = vadd.f32 %v1896_v24, %v1762_v8  ;;  %v1182_v24 = vld [vmem:[%s2260_s7] sm:$0xff] }
 0x136   :  { %710 = vmatmul.f32.gmra.mxu2 %v573_v43  ;;  %823 = vmatmul.f32.gmra.mxu3 %v574_v25  ;;  %vm861_vm2 = vcmp.gt.f32.partialorder %v774_v2, 0.0  ;;  %v893_v26 = vmul.f32 0.1, %v774_v2  ;;  %v273_v25 = vadd.f32 %v1856_v6, %v1760_v7 }
 0x137   :  { %vm464_vm12 = vcmp.gt.f32.partialorder %v398_v33, 0.0 }
 0x138   :  { %v925_v30 = vsel %vm861_vm2, %v774_v2, %v893_v26  ;;  %v386_v26 = vadd.f32 %v1863_v20, %v1762_v8  ;;  %vm455_vm15 = vcmp.gt.f32.partialorder %v273_v25, 0.0  ;;  %vm457_vm2 = vcmp.gt.f32.partialorder %v276_v46, 0.0 }
 0x139   :  { %v663_v31 = vpop.f32.mrf.mxu2  ;;  %v776_v34 = vpop.f32.mrf.mxu3  ;;  %1001 = vmatmul.f32.gmra.mxu0 %v925_v30  ;;  %v582_v30 = vsel %vm454_vm13, %v383_v12, %v518_v56  ;;  %v585_v61 = vsel %vm457_vm2, %v276_v46, %v521_v28 }
 0x13a   :  { %v664_v38 = vadd.f32 %v1918_v52, %v663_v31  ;;  %v520_v6 = vmul.f32 0.1, %v386_v26  ;;  %vm456_vm0 = vcmp.gt.f32.partialorder %v386_v26, 0.0 }
 0x13c   :  { %v777_v27 = vadd.f32 %v776_v34, %v664_v38  ;;  %v1187_v34 = vld [vmem:[%s2260_s7 + $0x28] sm:$0xff] }
 0x13d   :  { %1212 = vmatpush.msrb.mxu1 %v1187_v34 }
 0x13e   :  { %713 = vmatmul.f32.gmra.mxu2 %v575_v22  ;;  %826 = vmatmul.f32.gmra.mxu3 %v576_v44  ;;  %vm862_vm5 = vcmp.gt.f32.partialorder %v777_v27, 0.0  ;;  %v894_v54 = vmul.f32 0.1, %v777_v27  ;;  %v389_v22 = vadd.f32 %v1872_v36, %v1762_v8 }
 0x140   :  { %v926_v48 = vsel %vm862_vm5, %v777_v27, %v894_v54  ;;  %v519_v27 = vmul.f32 0.1, %v273_v25  ;;  %v584_v54 = vsel %vm456_vm0, %v386_v26, %v520_v6  ;;  %v522_v21 = vmul.f32 0.1, %v389_v22 }
 0x141   :  { %v666_v49 = vpop.f32.mrf.mxu2  ;;  %v779_v50 = vpop.f32.mrf.mxu3  ;;  %1004 = vmatmul.f32.gmra.mxu0 %v926_v48  ;;  %v1186_v48 = vld [vmem:[%s2260_s7 + $0x20] sm:$0xff]  ;;  %vm458_vm3 = vcmp.gt.f32.partialorder %v389_v22, 0.0 }
 0x142   :  { %v667_v58 = vadd.f32 %v1918_v52, %v666_v49  ;;  %v583_v44 = vsel %vm455_vm15, %v273_v25, %v519_v27  ;;  %1213 = vmatpush.msrb.mxu1 %v1186_v48  ;;  %v1183_v25 = vld [vmem:[%s2260_s7 + $0x8] sm:$0xff] }
 0x144   :  { %v780_v40 = vadd.f32 %v779_v50, %v667_v58 }
 0x146   :  { %716 = vmatmul.f32.gmra.mxu2 %v577_v62  ;;  %829 = vmatmul.f32.gmra.mxu3 %v578_v23  ;;  %vm863_vm8 = vcmp.gt.f32.partialorder %v780_v40, 0.0  ;;  %v895_v32 = vmul.f32 0.1, %v780_v40  ;;  %v586_v62 = vsel %vm458_vm3, %v389_v22, %v522_v21 }
 0x148   :  { %v927_v1 = vsel %vm863_vm8, %v780_v40, %v895_v32  ;;  %v279_v40 = vadd.f32 %v1874_v39, %v1760_v7  ;;  %v1185_v32 = vld [vmem:[%s2260_s7 + $0x18] sm:$0xff]  ;;  %v524_v39 = vmul.f32 0.1, %v392_v59  ;;  %vm461_vm8 = vcmp.gt.f32.partialorder %v282_v41, 0.0 }
 0x149   :  { %v669_v63 = vpop.f32.mrf.mxu2  ;;  %v782_v0 = vpop.f32.mrf.mxu3  ;;  %1007 = vmatmul.f32.gmra.mxu0 %v927_v1  ;;  %1214 = vmatpush.msrb.mxu1 %v1185_v32 }
 0x14a   :  { %v670_v10 = vadd.f32 %v1918_v52, %v669_v63  ;;  %vm459_vm5 = vcmp.gt.f32.partialorder %v279_v40, 0.0  ;;  %v588_v11 = vsel %vm460_vm6, %v392_v59, %v524_v39 }
 0x14c   :  { %v783_v53 = vadd.f32 %v782_v0, %v670_v10  ;;  %v523_v0 = vmul.f32 0.1, %v279_v40  ;;  %v395_v10 = vadd.f32 %v1890_v9, %v1762_v8 }
 0x14e   :  { %719 = vmatmul.f32.gmra.mxu2 %v579_v13  ;;  %832 = vmatmul.f32.gmra.mxu3 %v580_v17  ;;  %vm864_vm11 = vcmp.gt.f32.partialorder %v783_v53, 0.0  ;;  %v896_v18 = vmul.f32 0.1, %v783_v53  ;;  %v1184_v13 = vld [vmem:[%s2260_s7 + $0x10] sm:$0xff]  ;;  %v526_v60 = vmul.f32 0.1, %v395_v10 }
 0x14f   :  { %1215 = vmatpush.msrb.mxu1 %v1184_v13  ;;  %vm462_vm9 = vcmp.gt.f32.partialorder %v395_v10, 0.0 }
 0x150   :  { %v928_v4 = vsel %vm864_vm11, %v783_v53, %v896_v18  ;;  %v587_v53 = vsel %vm459_vm5, %v279_v40, %v523_v0 }
 0x151   :  { %v672_v2 = vpop.f32.mrf.mxu2  ;;  %v785_v15 = vpop.f32.mrf.mxu3  ;;  %1010 = vmatmul.f32.gmra.mxu0 %v928_v4  ;;  %v525_v4 = vmul.f32 0.1, %v282_v41  ;;  %1216 = vmatpush.msrb.mxu1 %v1183_v25 }
 0x152   :  { %v673_v43 = vadd.f32 %v1918_v52, %v672_v2 }
 0x153   :  { %v589_v56 = vsel %vm461_vm8, %v282_v41, %v525_v4  ;;  %1217 = vmatpush.msrb.mxu1 %v1182_v24 }
 0x154   :  { %v786_v5 = vadd.f32 %v785_v15, %v673_v43  ;;  %v285_v15 = vadd.f32 %v1892_v14, %v1760_v7  ;;  %v590_v43 = vsel %vm462_vm9, %v395_v10, %v526_v60  ;;  %v528_v14 = vmul.f32 0.1, %v398_v33 }
 0x156   :  { %v897_v31 = vmul.f32 0.1, %v786_v5  ;;  %722 = vmatmul.f32.gmra.mxu2 %v581_v29  ;;  %835 = vmatmul.f32.gmra.mxu3 %v582_v30  ;;  %vm865_vm14 = vcmp.gt.f32.partialorder %v786_v5, 0.0  ;;  %vm463_vm11 = vcmp.gt.f32.partialorder %v285_v15, 0.0  ;;  %v592_v6 = vsel %vm464_vm12, %v398_v33, %v528_v14 }
 0x158   :  { %v929_v35 = vsel %vm865_vm14, %v786_v5, %v897_v31  ;;  %v527_v31 = vmul.f32 0.1, %v285_v15 }
 0x159   :  { %v675_v16 = vpop.f32.mrf.mxu2  ;;  %v788_v38 = vpop.f32.mrf.mxu3  ;;  %1013 = vmatmul.f32.gmra.mxu0 %v929_v35 }
 0x15a   :  { %v676_v45 = vadd.f32 %v1918_v52, %v675_v16  ;;  %v288_v16 = vadd.f32 %v1903_v37, %v1760_v7  ;;  %v591_v27 = vsel %vm463_vm11, %v285_v15, %v527_v31 }
 0x15c   :  { %v789_v20 = vadd.f32 %v788_v38, %v676_v45  ;;  %v401_v38 = vadd.f32 %v1906_v42, %v1762_v8  ;;  %vm465_vm14 = vcmp.gt.f32.partialorder %v288_v16, 0.0 }
 0x15e   :  { %v898_v47 = vmul.f32 0.1, %v789_v20  ;;  %725 = vmatmul.f32.gmra.mxu2 %v583_v44  ;;  %838 = vmatmul.f32.gmra.mxu3 %v584_v54  ;;  %vm866_vm1 = vcmp.gt.f32.partialorder %v789_v20, 0.0  ;;  %v529_v44 = vmul.f32 0.1, %v288_v16  ;;  %vm466_vm15 = vcmp.gt.f32.partialorder %v401_v38, 0.0 }
 0x15f   :  { %v530_v54 = vmul.f32 0.1, %v401_v38 }
 0x160   :  { %v930_v49 = vsel %vm866_vm1, %v789_v20, %v898_v47  ;;  %v593_v37 = vsel %vm465_vm14, %v288_v16, %v529_v44 }
 0x161   :  { %v678_v50 = vpop.f32.mrf.mxu2  ;;  %v791_v57 = vpop.f32.mrf.mxu3  ;;  %1016 = vmatmul.f32.gmra.mxu0 %v930_v49  ;;  %v594_v48 = vsel %vm466_vm15, %v401_v38, %v530_v54 }
 0x162   :  { %v679_v58 = vadd.f32 %v1918_v52, %v678_v50 }
 0x164   :  { %v792_v36 = vadd.f32 %v791_v57, %v679_v58 }
 0x166   :  { %v899_v23 = vmul.f32 0.1, %v792_v36  ;;  %728 = vmatmul.f32.gmra.mxu2 %v585_v61  ;;  %841 = vmatmul.f32.gmra.mxu3 %v586_v62  ;;  %vm867_vm4 = vcmp.gt.f32.partialorder %v792_v36, 0.0  ;;  %v2038_v61 = vld [vmem:[%s2261_s6] ss:$0 sm:$0xff] }
 0x168   :  { %v931_v55 = vsel %vm867_vm4, %v792_v36, %v899_v23 }
 0x169   :  { %v681_v1 = vpop.f32.mrf.mxu2  ;;  %v794_v63 = vpop.f32.mrf.mxu3  ;;  %1019 = vmatmul.f32.gmra.mxu0 %v931_v55 }
 0x16a   :  { %v682_v3 = vadd.f32 %v1918_v52, %v681_v1 }
 0x16c   :  { %v795_v51 = vadd.f32 %v794_v63, %v682_v3 }
 0x16e   :  { %v900_v12 = vmul.f32 0.1, %v795_v51  ;;  %731 = vmatmul.f32.gmra.mxu2 %v587_v53  ;;  %844 = vmatmul.f32.gmra.mxu3 %v588_v11  ;;  %vm868_vm7 = vcmp.gt.f32.partialorder %v795_v51, 0.0 }
 0x170   :  { %v932_v17 = vsel %vm868_vm7, %v795_v51, %v900_v12 }
 0x171   :  { %v684_v18 = vpop.f32.mrf.mxu2  ;;  %v797_v19 = vpop.f32.mrf.mxu3  ;;  %1022 = vmatmul.f32.gmra.mxu0 %v932_v17 }
 0x172   :  { %v685_v2 = vadd.f32 %v1918_v52, %v684_v18 }
 0x174   :  { %v798_v9 = vadd.f32 %v797_v19, %v685_v2 }
 0x176   :  { %v901_v5 = vmul.f32 0.1, %v798_v9  ;;  %734 = vmatmul.f32.gmra.mxu2 %v589_v56  ;;  %847 = vmatmul.f32.gmra.mxu3 %v590_v43  ;;  %vm869_vm10 = vcmp.gt.f32.partialorder %v798_v9, 0.0 }
 0x178   :  { %v933_v26 = vsel %vm869_vm10, %v798_v9, %v901_v5 }
 0x179   :  { %v687_v29 = vpop.f32.mrf.mxu2  ;;  %v800_v30 = vpop.f32.mrf.mxu3  ;;  %1025 = vmatmul.f32.gmra.mxu0 %v933_v26 }
 0x17a   :  { %v688_v34 = vadd.f32 %v1918_v52, %v687_v29 }
 0x17c   :  { %v801_v35 = vadd.f32 %v800_v30, %v688_v34 }
 0x17e   :  { %v902_v45 = vmul.f32 0.1, %v801_v35  ;;  %737 = vmatmul.f32.gmra.mxu2 %v591_v27  ;;  %850 = vmatmul.f32.gmra.mxu3 %v592_v6  ;;  %vm870_vm13 = vcmp.gt.f32.partialorder %v801_v35, 0.0 }
 0x180   :  { %v934_v20 = vsel %vm870_vm13, %v801_v35, %v902_v45 }
 0x181   :  { %v690_v46 = vpop.f32.mrf.mxu2  ;;  %v803_v22 = vpop.f32.mrf.mxu3  ;;  %1028 = vmatmul.f32.gmra.mxu0 %v934_v20 }
 0x182   :  { %v691_v47 = vadd.f32 %v1918_v52, %v690_v46 }
 0x184   :  { %v804_v7 = vadd.f32 %v803_v22, %v691_v47 }
 0x186   :  { %v903_v8 = vmul.f32 0.1, %v804_v7  ;;  %740 = vmatmul.f32.gmra.mxu2 %v593_v37  ;;  %853 = vmatmul.f32.gmra.mxu3 %v594_v48  ;;  %vm871_vm0 = vcmp.gt.f32.partialorder %v804_v7, 0.0 }
 0x188   :  { %v935_v42 = vsel %vm871_vm0, %v804_v7, %v903_v8 }
 0x189   :  { %v693_v49 = vpop.f32.mrf.mxu2  ;;  %v806_v50 = vpop.f32.mrf.mxu3  ;;  %1031 = vmatmul.f32.gmra.mxu0 %v935_v42 }
 0x18a   :  { %v694_v57 = vadd.f32 %v1918_v52, %v693_v49 }
 0x18c   :  { %v807_v28 = vadd.f32 %v806_v50, %v694_v57 }
 0x18e   :  { %v904_v21 = vmul.f32 0.1, %v807_v28  ;;  %vm872_vm1 = vcmp.gt.f32.partialorder %v807_v28, 0.0 }
 0x190   :  { %v936_v58 = vsel %vm872_vm1, %v807_v28, %v904_v21 }
 0x191   :  { %v696_v36 = vpop.f32.mrf.mxu2  ;;  %v809_v40 = vpop.f32.mrf.mxu3  ;;  %1034 = vmatmul.f32.gmra.mxu0 %v936_v58 }
 0x192   :  { %v697_v59 = vadd.f32 %v1918_v52, %v696_v36 }
 0x194   :  { %v810_v62 = vadd.f32 %v809_v40, %v697_v59 }
 0x196   :  { %v905_v23 = vmul.f32 0.1, %v810_v62  ;;  %v990_v32 = vpop.f32.mrf.mxu0  ;;  %vm873_vm2 = vcmp.gt.f32.partialorder %v810_v62, 0.0 }
 0x197   :  { %v991_v55 = vadd.f32 %v2038_v61, %v990_v32 }
 0x198   :  { %v937_v1 = vsel %vm873_vm2, %v810_v62, %v905_v23 }
 0x199   :  { %v699_v63 = vpop.f32.mrf.mxu2  ;;  %v812_v0 = vpop.f32.mrf.mxu3  ;;  %1037 = vmatmul.f32.gmra.mxu0 %v937_v1  ;;  %vm1086_vm3 = vcmp.gt.f32.partialorder %v991_v55, 0.0  ;;  %v1118_v39 = vmul.f32 0.1, %v991_v55 }
 0x19a   :  { %v700_v3 = vadd.f32 %v1918_v52, %v699_v63 }
 0x19b   :  { %v1150_v51 = vsel %vm1086_vm3, %v991_v55, %v1118_v39 }
 0x19c   :  { %v813_v41 = vadd.f32 %v812_v0, %v700_v3  ;;  %1218 = vmatmul.f32.vlgmr.msrb.gmra.mxu1 %v1150_v51 }
 0x19e   :  { %v906_v10 = vmul.f32 0.1, %v813_v41  ;;  %v993_v53 = vpop.f32.mrf.mxu0  ;;  %vm874_vm4 = vcmp.gt.f32.partialorder %v813_v41, 0.0 }
 0x19f   :  { %v994_v11 = vadd.f32 %v2038_v61, %v993_v53 }
 0x1a0   :  { %v938_v12 = vsel %vm874_vm4, %v813_v41, %v906_v10 }
 0x1a1   :  { %v702_v13 = vpop.f32.mrf.mxu2  ;;  %v815_v17 = vpop.f32.mrf.mxu3  ;;  %1040 = vmatmul.f32.gmra.mxu0 %v938_v12  ;;  %vm1087_vm5 = vcmp.gt.f32.partialorder %v994_v11, 0.0  ;;  %v1119_v18 = vmul.f32 0.1, %v994_v11 }
 0x1a2   :  { %v703_v19 = vadd.f32 %v1918_v52, %v702_v13 }
 0x1a3   :  { %v1151_v4 = vsel %vm1087_vm5, %v994_v11, %v1119_v18 }
 0x1a4   :  { %v816_v60 = vadd.f32 %v815_v17, %v703_v19  ;;  %1221 = vmatmul.f32.gmra.mxu1 %v1151_v4 }
 0x1a6   :  { %v907_v2 = vmul.f32 0.1, %v816_v60  ;;  %v996_v9 = vpop.f32.mrf.mxu0  ;;  %vm875_vm6 = vcmp.gt.f32.partialorder %v816_v60, 0.0 }
 0x1a7   :  { %v997_v15 = vadd.f32 %v2038_v61, %v996_v9 }
 0x1a8   :  { %v939_v33 = vsel %vm875_vm6, %v816_v60, %v907_v2 }
 0x1a9   :  { %v705_v56 = vpop.f32.mrf.mxu2  ;;  %v818_v43 = vpop.f32.mrf.mxu3  ;;  %1043 = vmatmul.f32.gmra.mxu0 %v939_v33  ;;  %vm1088_vm7 = vcmp.gt.f32.partialorder %v997_v15, 0.0  ;;  %v1120_v5 = vmul.f32 0.1, %v997_v15 }
 0x1aa   :  { %v706_v25 = vadd.f32 %v1918_v52, %v705_v56 }
 0x1ab   :  { %v1152_v26 = vsel %vm1088_vm7, %v997_v15, %v1120_v5 }
 0x1ac   :  { %v819_v29 = vadd.f32 %v818_v43, %v706_v25  ;;  %1224 = vmatmul.f32.gmra.mxu1 %v1152_v26 }
 0x1ae   :  { %v908_v30 = vmul.f32 0.1, %v819_v29  ;;  %v999_v31 = vpop.f32.mrf.mxu0  ;;  %vm876_vm8 = vcmp.gt.f32.partialorder %v819_v29, 0.0 }
 0x1af   :  { %v1000_v14 = vadd.f32 %v2038_v61, %v999_v31 }
 0x1b0   :  { %v940_v34 = vsel %vm876_vm8, %v819_v29, %v908_v30 }
 0x1b1   :  { %v708_v24 = vpop.f32.mrf.mxu2  ;;  %v821_v35 = vpop.f32.mrf.mxu3  ;;  %1046 = vmatmul.f32.gmra.mxu0 %v940_v34  ;;  %vm1089_vm9 = vcmp.gt.f32.partialorder %v1000_v14, 0.0  ;;  %v1121_v16 = vmul.f32 0.1, %v1000_v14 }
 0x1b2   :  { %v709_v38 = vadd.f32 %v1918_v52, %v708_v24 }
 0x1b3   :  { %v1153_v27 = vsel %vm1089_vm9, %v1000_v14, %v1121_v16 }
 0x1b4   :  { %v822_v6 = vadd.f32 %v821_v35, %v709_v38  ;;  %1227 = vmatmul.f32.gmra.mxu1 %v1153_v27 }
 0x1b6   :  { %v909_v45 = vmul.f32 0.1, %v822_v6  ;;  %v1002_v20 = vpop.f32.mrf.mxu0  ;;  %vm877_vm10 = vcmp.gt.f32.partialorder %v822_v6, 0.0 }
 0x1b7   :  { %v1003_v46 = vadd.f32 %v2038_v61, %v1002_v20 }
 0x1b8   :  { %v941_v22 = vsel %vm877_vm10, %v822_v6, %v909_v45 }
 0x1b9   :  { %v711_v44 = vpop.f32.mrf.mxu2  ;;  %v824_v54 = vpop.f32.mrf.mxu3  ;;  %1049 = vmatmul.f32.gmra.mxu0 %v941_v22  ;;  %vm1090_vm11 = vcmp.gt.f32.partialorder %v1003_v46, 0.0  ;;  %v1122_v47 = vmul.f32 0.1, %v1003_v46 }
 0x1ba   :  { %v712_v7 = vadd.f32 %v1918_v52, %v711_v44 }
 0x1bb   :  { %v1154_v37 = vsel %vm1090_vm11, %v1003_v46, %v1122_v47 }
 0x1bc   :  { %v825_v48 = vadd.f32 %v824_v54, %v712_v7  ;;  %1230 = vmatmul.f32.gmra.mxu1 %v1154_v37 }
 0x1be   :  { %v910_v8 = vmul.f32 0.1, %v825_v48  ;;  %v1005_v42 = vpop.f32.mrf.mxu0  ;;  %vm878_vm12 = vcmp.gt.f32.partialorder %v825_v48, 0.0 }
 0x1bf   :  { %v1006_v49 = vadd.f32 %v2038_v61, %v1005_v42 }
 0x1c0   :  { %v942_v50 = vsel %vm878_vm12, %v825_v48, %v910_v8 }
 0x1c1   :  { %v714_v57 = vpop.f32.mrf.mxu2  ;;  %v827_v28 = vpop.f32.mrf.mxu3  ;;  %1052 = vmatmul.f32.gmra.mxu0 %v942_v50  ;;  %vm1091_vm13 = vcmp.gt.f32.partialorder %v1006_v49, 0.0  ;;  %v1123_v21 = vmul.f32 0.1, %v1006_v49 }
 0x1c2   :  { %v715_v58 = vadd.f32 %v1918_v52, %v714_v57 }
 0x1c3   :  { %v1155_v36 = vsel %vm1091_vm13, %v1006_v49, %v1123_v21 }
 0x1c4   :  { %v828_v40 = vadd.f32 %v827_v28, %v715_v58  ;;  %1233 = vmatmul.f32.gmra.mxu1 %v1155_v36 }
 0x1c6   :  { %v911_v59 = vmul.f32 0.1, %v828_v40  ;;  %v1008_v62 = vpop.f32.mrf.mxu0  ;;  %vm879_vm14 = vcmp.gt.f32.partialorder %v828_v40, 0.0 }
 0x1c7   :  { %v1009_v23 = vadd.f32 %v2038_v61, %v1008_v62 }
 0x1c8   :  { %v943_v32 = vsel %vm879_vm14, %v828_v40, %v911_v59 }
 0x1c9   :  { %v717_v55 = vpop.f32.mrf.mxu2  ;;  %v830_v1 = vpop.f32.mrf.mxu3  ;;  %1055 = vmatmul.f32.gmra.mxu0 %v943_v32  ;;  %vm1092_vm15 = vcmp.gt.f32.partialorder %v1009_v23, 0.0  ;;  %v1124_v63 = vmul.f32 0.1, %v1009_v23 }
 0x1ca   :  { %v718_v0 = vadd.f32 %v1918_v52, %v717_v55 }
 0x1cb   :  { %v1156_v39 = vsel %vm1092_vm15, %v1009_v23, %v1124_v63 }
 0x1cc   :  { %v831_v3 = vadd.f32 %v830_v1, %v718_v0  ;;  %1236 = vmatmul.f32.gmra.mxu1 %v1156_v39 }
 0x1ce   :  { %v912_v51 = vmul.f32 0.1, %v831_v3  ;;  %v1011_v41 = vpop.f32.mrf.mxu0  ;;  %vm880_vm0 = vcmp.gt.f32.partialorder %v831_v3, 0.0 }
 0x1cf   :  { %v1012_v10 = vadd.f32 %v2038_v61, %v1011_v41 }
 0x1d0   :  { %v944_v53 = vsel %vm880_vm0, %v831_v3, %v912_v51 }
 0x1d1   :  { %v720_v11 = vpop.f32.mrf.mxu2  ;;  %v833_v12 = vpop.f32.mrf.mxu3  ;;  %1058 = vmatmul.f32.gmra.mxu0 %v944_v53  ;;  %vm1093_vm1 = vcmp.gt.f32.partialorder %v1012_v10, 0.0  ;;  %v1125_v13 = vmul.f32 0.1, %v1012_v10 }
 0x1d2   :  { %v721_v17 = vadd.f32 %v1918_v52, %v720_v11 }
 0x1d3   :  { %v1157_v18 = vsel %vm1093_vm1, %v1012_v10, %v1125_v13 }
 0x1d4   :  { %v834_v19 = vadd.f32 %v833_v12, %v721_v17  ;;  %1239 = vmatmul.f32.gmra.mxu1 %v1157_v18 }
 0x1d6   :  { %v913_v4 = vmul.f32 0.1, %v834_v19  ;;  %v1014_v60 = vpop.f32.mrf.mxu0  ;;  %vm881_vm2 = vcmp.gt.f32.partialorder %v834_v19, 0.0 }
 0x1d7   :  { %v1015_v2 = vadd.f32 %v2038_v61, %v1014_v60 }
 0x1d8   :  { %v945_v9 = vsel %vm881_vm2, %v834_v19, %v913_v4  ;;  %vm1315_vm2 = vcmask 64512  }
 0x1d9   :  { %v1126_v15 = vmul.f32 0.1, %v1015_v2  ;;  %v723_v33 = vpop.f32.mrf.mxu2  ;;  %v836_v56 = vpop.f32.mrf.mxu3  ;;  %1061 = vmatmul.f32.gmra.mxu0 %v945_v9  ;;  %vm1094_vm3 = vcmp.gt.f32.partialorder %v1015_v2, 0.0 }
 0x1da   :  { %v724_v43 = vadd.f32 %v1918_v52, %v723_v33 }
 0x1db   :  { %v1158_v5 = vsel %vm1094_vm3, %v1015_v2, %v1126_v15  ;;  %v1439_v15 = vld [vmem:[%s2259_s4] ss:$0 sm:$0xff] }
 0x1dc   :  { %v837_v25 = vadd.f32 %v836_v56, %v724_v43  ;;  %1242 = vmatmul.f32.gmra.mxu1 %v1158_v5 }
 0x1de   :  { %v914_v26 = vmul.f32 0.1, %v837_v25  ;;  %v1017_v29 = vpop.f32.mrf.mxu0  ;;  %vm882_vm4 = vcmp.gt.f32.partialorder %v837_v25, 0.0 }
 0x1df   :  { %v1018_v30 = vadd.f32 %v2038_v61, %v1017_v29 }
 0x1e0   :  { %v946_v31 = vsel %vm882_vm4, %v837_v25, %v914_v26 }
 0x1e1   :  { %v1127_v14 = vmul.f32 0.1, %v1018_v30  ;;  %v726_v34 = vpop.f32.mrf.mxu2  ;;  %v839_v24 = vpop.f32.mrf.mxu3  ;;  %1064 = vmatmul.f32.gmra.mxu0 %v946_v31  ;;  %vm1095_vm5 = vcmp.gt.f32.partialorder %v1018_v30, 0.0 }
 0x1e2   :  { %v727_v35 = vadd.f32 %v1918_v52, %v726_v34  ;;  %v2076_v34 = vld [vmem:[%s2262_s8] ss:$0 sm:$0xff] }
 0x1e3   :  { %v1159_v16 = vsel %vm1095_vm5, %v1018_v30, %v1127_v14 }
 0x1e4   :  { %v840_v38 = vadd.f32 %v839_v24, %v727_v35  ;;  %1245 = vmatmul.f32.gmra.mxu1 %v1159_v16 }
 0x1e6   :  { %v915_v27 = vmul.f32 0.1, %v840_v38  ;;  %v1020_v6 = vpop.f32.mrf.mxu0  ;;  %vm883_vm6 = vcmp.gt.f32.partialorder %v840_v38, 0.0 }
 0x1e7   :  { %v1021_v45 = vadd.f32 %v2038_v61, %v1020_v6 }
 0x1e8   :  { %v947_v20 = vsel %vm883_vm6, %v840_v38, %v915_v27 }
 0x1e9   :  { %v1128_v46 = vmul.f32 0.1, %v1021_v45  ;;  %v729_v22 = vpop.f32.mrf.mxu2  ;;  %v842_v44 = vpop.f32.mrf.mxu3  ;;  %1067 = vmatmul.f32.gmra.mxu0 %v947_v20  ;;  %vm1096_vm7 = vcmp.gt.f32.partialorder %v1021_v45, 0.0 }
 0x1ea   :  { %v730_v54 = vadd.f32 %v1918_v52, %v729_v22 }
 0x1eb   :  { %v1160_v47 = vsel %vm1096_vm7, %v1021_v45, %v1128_v46 }
 0x1ec   :  { %v843_v7 = vadd.f32 %v842_v44, %v730_v54  ;;  %1248 = vmatmul.f32.gmra.mxu1 %v1160_v47 }
 0x1ee   :  { %v916_v37 = vmul.f32 0.1, %v843_v7  ;;  %v1023_v48 = vpop.f32.mrf.mxu0  ;;  %vm884_vm8 = vcmp.gt.f32.partialorder %v843_v7, 0.0 }
 0x1ef   :  { %v1024_v8 = vadd.f32 %v2038_v61, %v1023_v48 }
 0x1f0   :  { %v948_v42 = vsel %vm884_vm8, %v843_v7, %v916_v37 }
 0x1f1   :  { %v1129_v49 = vmul.f32 0.1, %v1024_v8  ;;  %v732_v50 = vpop.f32.mrf.mxu2  ;;  %v845_v57 = vpop.f32.mrf.mxu3  ;;  %1070 = vmatmul.f32.gmra.mxu0 %v948_v42  ;;  %vm1097_vm9 = vcmp.gt.f32.partialorder %v1024_v8, 0.0 }
 0x1f2   :  { %v733_v28 = vadd.f32 %v1918_v52, %v732_v50 }
 0x1f3   :  { %v1161_v21 = vsel %vm1097_vm9, %v1024_v8, %v1129_v49 }
 0x1f4   :  { %v846_v58 = vadd.f32 %v845_v57, %v733_v28  ;;  %1251 = vmatmul.f32.gmra.mxu1 %v1161_v21 }
 0x1f6   :  { %v917_v36 = vmul.f32 0.1, %v846_v58  ;;  %v1026_v40 = vpop.f32.mrf.mxu0  ;;  %vm885_vm10 = vcmp.gt.f32.partialorder %v846_v58, 0.0 }
 0x1f7   :  { %v1027_v59 = vadd.f32 %v2038_v61, %v1026_v40 }
 0x1f8   :  { %v949_v62 = vsel %vm885_vm10, %v846_v58, %v917_v36 }
 0x1f9   :  { %v1130_v23 = vmul.f32 0.1, %v1027_v59  ;;  %v735_v32 = vpop.f32.mrf.mxu2  ;;  %v848_v55 = vpop.f32.mrf.mxu3  ;;  %1073 = vmatmul.f32.gmra.mxu0 %v949_v62  ;;  %vm1098_vm11 = vcmp.gt.f32.partialorder %v1027_v59, 0.0 }
 0x1fa   :  { %v736_v1 = vadd.f32 %v1918_v52, %v735_v32 }
 0x1fb   :  { %v1162_v63 = vsel %vm1098_vm11, %v1027_v59, %v1130_v23 }
 0x1fc   :  { %v849_v0 = vadd.f32 %v848_v55, %v736_v1  ;;  %1254 = vmatmul.f32.gmra.mxu1 %v1162_v63 }
 0x1fe   :  { %v918_v39 = vmul.f32 0.1, %v849_v0  ;;  %v1029_v3 = vpop.f32.mrf.mxu0  ;;  %vm886_vm12 = vcmp.gt.f32.partialorder %v849_v0, 0.0 }
 0x1ff   :  { %v1030_v51 = vadd.f32 %v2038_v61, %v1029_v3 }
 0x200   :  { %v950_v41 = vsel %vm886_vm12, %v849_v0, %v918_v39 }
 0x201   :  { %v1131_v10 = vmul.f32 0.1, %v1030_v51  ;;  %v738_v53 = vpop.f32.mrf.mxu2  ;;  %v851_v11 = vpop.f32.mrf.mxu3  ;;  %1076 = vmatmul.f32.gmra.mxu0 %v950_v41  ;;  %vm1099_vm13 = vcmp.gt.f32.partialorder %v1030_v51, 0.0 }
 0x202   :  { %v739_v12 = vadd.f32 %v1918_v52, %v738_v53 }
 0x203   :  { %v1163_v13 = vsel %vm1099_vm13, %v1030_v51, %v1131_v10 }
 0x204   :  { %v852_v17 = vadd.f32 %v851_v11, %v739_v12  ;;  %1257 = vmatmul.f32.gmra.mxu1 %v1163_v13 }
 0x206   :  { %v919_v18 = vmul.f32 0.1, %v852_v17  ;;  %v1032_v19 = vpop.f32.mrf.mxu0  ;;  %vm887_vm14 = vcmp.gt.f32.partialorder %v852_v17, 0.0 }
 0x207   :  { %v1033_v4 = vadd.f32 %v2038_v61, %v1032_v19 }
 0x208   :  { %v951_v60 = vsel %vm887_vm14, %v852_v17, %v919_v18 }
 0x209   :  { %v1132_v2 = vmul.f32 0.1, %v1033_v4  ;;  %v741_v9 = vpop.f32.mrf.mxu2  ;;  %1079 = vmatmul.f32.gmra.mxu0 %v951_v60  ;;  %vm1100_vm15 = vcmp.gt.f32.partialorder %v1033_v4, 0.0  ;;  %v854_v56 = vpop.f32.mrf.mxu3 }
 0x20a   :  { %v742_v33 = vadd.f32 %v1439_v15, %v741_v9 }
 0x20b   :  { %v1164_v52 = vsel %vm1100_vm15, %v1033_v4, %v1132_v2 }
 0x20c   :  { %v855_v43 = vadd.f32 %v854_v56, %v742_v33  ;;  %1260 = vmatmul.f32.gmra.mxu1 %v1164_v52 }
 0x20e   :  { %vm888_vm0 = vcmp.gt.f32.partialorder %v855_v43, 0.0  ;;  %v920_v5 = vmul.f32 0.1, %v855_v43  ;;  %v1035_v25 = vpop.f32.mrf.mxu0 }
 0x20f   :  { %v1036_v26 = vadd.f32 %v2038_v61, %v1035_v25 }
 0x210   :  { %v952_v29 = vsel %vm888_vm0, %v855_v43, %v920_v5 }
 0x211   :  { %v1133_v30 = vmul.f32 0.1, %v1036_v26  ;;  %1082 = vmatmul.f32.vlgmr.msra.gmra.mxu2 %v952_v29  ;;  %vm1101_vm1 = vcmp.gt.f32.partialorder %v1036_v26, 0.0 }
 0x213   :  { %v1165_v31 = vsel %vm1101_vm1, %v1036_v26, %v1133_v30 }
 0x214   :  { %1263 = vmatmul.f32.gmra.mxu1 %v1165_v31 }
 0x216   :  { %v1038_v14 = vpop.f32.mrf.mxu0 }
 0x217   :  { %v1039_v24 = vadd.f32 %v2038_v61, %v1038_v14 }
 0x219   :  { %v1134_v35 = vmul.f32 0.1, %v1039_v24  ;;  %v1219_v16 = vpop.f32.mrf.mxu1  ;;  %vm1102_vm3 = vcmp.gt.f32.partialorder %v1039_v24, 0.0 }
 0x21a   :  { %v1220_v38 = vadd.f32 %v2076_v34, %v1219_v16 }
 0x21b   :  { %v1166_v27 = vsel %vm1102_vm3, %v1039_v24, %v1134_v35 }
 0x21c   :  { %1316 = vst.msk [vmem:[%s2263_s9] sm:$0xff] %vm1315_vm2, %v1220_v38  ;;  %1266 = vmatmul.f32.gmra.mxu1 %v1166_v27 }
 0x21e   :  { %v1041_v6 = vpop.f32.mrf.mxu0 }
 0x21f   :  { %v1042_v45 = vadd.f32 %v2038_v61, %v1041_v6 }
 0x221   :  { %v1135_v20 = vmul.f32 0.1, %v1042_v45  ;;  %v1222_v46 = vpop.f32.mrf.mxu1  ;;  %vm1103_vm4 = vcmp.gt.f32.partialorder %v1042_v45, 0.0 }
 0x222   :  { %v1223_v22 = vadd.f32 %v2076_v34, %v1222_v46 }
 0x223   :  { %v1167_v44 = vsel %vm1103_vm4, %v1042_v45, %v1135_v20 }
 0x224   :  { %1317 = vst.msk [vmem:[%s2263_s9 + $0x8] sm:$0xff] %vm1315_vm2, %v1223_v22  ;;  %1269 = vmatmul.f32.gmra.mxu1 %v1167_v44 }
 0x226   :  { %v1044_v54 = vpop.f32.mrf.mxu0 }
 0x227   :  { %v1045_v47 = vadd.f32 %v2038_v61, %v1044_v54 }
 0x229   :  { %v1136_v7 = vmul.f32 0.1, %v1045_v47  ;;  %v1225_v37 = vpop.f32.mrf.mxu1  ;;  %vm1104_vm5 = vcmp.gt.f32.partialorder %v1045_v47, 0.0 }
 0x22a   :  { %v1226_v48 = vadd.f32 %v2076_v34, %v1225_v37 }
 0x22b   :  { %v1168_v8 = vsel %vm1104_vm5, %v1045_v47, %v1136_v7 }
 0x22c   :  { %1318 = vst.msk [vmem:[%s2263_s9 + $0x10] sm:$0xff] %vm1315_vm2, %v1226_v48  ;;  %1272 = vmatmul.f32.gmra.mxu1 %v1168_v8 }
 0x22e   :  { %v1047_v42 = vpop.f32.mrf.mxu0 }
 0x22f   :  { %v1048_v49 = vadd.f32 %v2038_v61, %v1047_v42 }
 0x231   :  { %v1137_v50 = vmul.f32 0.1, %v1048_v49  ;;  %v1228_v57 = vpop.f32.mrf.mxu1  ;;  %vm1105_vm6 = vcmp.gt.f32.partialorder %v1048_v49, 0.0 }
 0x232   :  { %v1229_v28 = vadd.f32 %v2076_v34, %v1228_v57 }
 0x233   :  { %v1169_v21 = vsel %vm1105_vm6, %v1048_v49, %v1137_v50 }
 0x234   :  { %1319 = vst.msk [vmem:[%s2263_s9 + $0x18] sm:$0xff] %vm1315_vm2, %v1229_v28  ;;  %1275 = vmatmul.f32.gmra.mxu1 %v1169_v21 }
 0x236   :  { %v1050_v58 = vpop.f32.mrf.mxu0 }
 0x237   :  { %v1051_v36 = vadd.f32 %v2038_v61, %v1050_v58 }
 0x239   :  { %v1138_v40 = vmul.f32 0.1, %v1051_v36  ;;  %v1231_v59 = vpop.f32.mrf.mxu1  ;;  %vm1106_vm7 = vcmp.gt.f32.partialorder %v1051_v36, 0.0 }
 0x23a   :  { %v1232_v62 = vadd.f32 %v2076_v34, %v1231_v59 }
 0x23b   :  { %v1170_v23 = vsel %vm1106_vm7, %v1051_v36, %v1138_v40 }
 0x23c   :  { %1320 = vst.msk [vmem:[%s2263_s9 + $0x20] sm:$0xff] %vm1315_vm2, %v1232_v62  ;;  %1278 = vmatmul.f32.gmra.mxu1 %v1170_v23 }
 0x23e   :  { %v1053_v32 = vpop.f32.mrf.mxu0 }
 0x23f   :  { %v1054_v55 = vadd.f32 %v2038_v61, %v1053_v32 }
 0x241   :  { %v1139_v1 = vmul.f32 0.1, %v1054_v55  ;;  %v1234_v63 = vpop.f32.mrf.mxu1  ;;  %vm1107_vm8 = vcmp.gt.f32.partialorder %v1054_v55, 0.0 }
 0x242   :  { %v1235_v0 = vadd.f32 %v2076_v34, %v1234_v63 }
 0x243   :  { %v1171_v39 = vsel %vm1107_vm8, %v1054_v55, %v1139_v1 }
 0x244   :  { %1321 = vst.msk [vmem:[%s2263_s9 + $0x28] sm:$0xff] %vm1315_vm2, %v1235_v0  ;;  %1281 = vmatmul.f32.gmra.mxu1 %v1171_v39 }
 0x246   :  { %v1056_v3 = vpop.f32.mrf.mxu0 }
 0x247   :  { %v1057_v51 = vadd.f32 %v2038_v61, %v1056_v3 }
 0x249   :  { %v1140_v41 = vmul.f32 0.1, %v1057_v51  ;;  %v1237_v10 = vpop.f32.mrf.mxu1  ;;  %vm1108_vm9 = vcmp.gt.f32.partialorder %v1057_v51, 0.0 }
 0x24a   :  { %v1238_v53 = vadd.f32 %v2076_v34, %v1237_v10 }
 0x24b   :  { %v1172_v11 = vsel %vm1108_vm9, %v1057_v51, %v1140_v41 }
 0x24c   :  { %1322 = vst.msk [vmem:[%s2263_s9 + $0x30] sm:$0xff] %vm1315_vm2, %v1238_v53  ;;  %1284 = vmatmul.f32.gmra.mxu1 %v1172_v11 }
 0x24e   :  { %v1059_v12 = vpop.f32.mrf.mxu0 }
 0x24f   :  { %v1060_v13 = vadd.f32 %v2038_v61, %v1059_v12 }
 0x251   :  { %v1141_v17 = vmul.f32 0.1, %v1060_v13  ;;  %v1240_v18 = vpop.f32.mrf.mxu1  ;;  %vm1109_vm10 = vcmp.gt.f32.partialorder %v1060_v13, 0.0 }
 0x252   :  { %v1241_v19 = vadd.f32 %v2076_v34, %v1240_v18 }
 0x253   :  { %v1173_v4 = vsel %vm1109_vm10, %v1060_v13, %v1141_v17 }
 0x254   :  { %1323 = vst.msk [vmem:[%s2263_s9 + $0x38] sm:$0xff] %vm1315_vm2, %v1241_v19  ;;  %1287 = vmatmul.f32.gmra.mxu1 %v1173_v4 }
 0x256   :  { %v1062_v60 = vpop.f32.mrf.mxu0 }
 0x257   :  { %v1063_v2 = vadd.f32 %v2038_v61, %v1062_v60 }
 0x259   :  { %v1142_v9 = vmul.f32 0.1, %v1063_v2  ;;  %v1243_v15 = vpop.f32.mrf.mxu1  ;;  %vm1110_vm11 = vcmp.gt.f32.partialorder %v1063_v2, 0.0 }
 0x25a   :  { %v1244_v33 = vadd.f32 %v2076_v34, %v1243_v15 }
 0x25b   :  { %v1174_v56 = vsel %vm1110_vm11, %v1063_v2, %v1142_v9 }
 0x25c   :  { %1324 = vst.msk [vmem:[%s2263_s9 + $0x40] sm:$0xff] %vm1315_vm2, %v1244_v33  ;;  %1290 = vmatmul.f32.gmra.mxu1 %v1174_v56 }
 0x25e   :  { %v1065_v52 = vpop.f32.mrf.mxu0 }
 0x25f   :  { %v1066_v43 = vadd.f32 %v2038_v61, %v1065_v52 }
 0x261   :  { %v1143_v5 = vmul.f32 0.1, %v1066_v43  ;;  %v1246_v25 = vpop.f32.mrf.mxu1  ;;  %vm1111_vm12 = vcmp.gt.f32.partialorder %v1066_v43, 0.0 }
 0x262   :  { %v1247_v26 = vadd.f32 %v2076_v34, %v1246_v25 }
 0x263   :  { %v1175_v29 = vsel %vm1111_vm12, %v1066_v43, %v1143_v5 }
 0x264   :  { %1325 = vst.msk [vmem:[%s2263_s9 + $0x48] sm:$0xff] %vm1315_vm2, %v1247_v26  ;;  %1293 = vmatmul.f32.gmra.mxu1 %v1175_v29 }
 0x266   :  { %v1068_v30 = vpop.f32.mrf.mxu0 }
 0x267   :  { %v1069_v31 = vadd.f32 %v2038_v61, %v1068_v30 }
 0x269   :  { %v1144_v14 = vmul.f32 0.1, %v1069_v31  ;;  %v1249_v24 = vpop.f32.mrf.mxu1  ;;  %vm1112_vm13 = vcmp.gt.f32.partialorder %v1069_v31, 0.0 }
 0x26a   :  { %v1250_v35 = vadd.f32 %v2076_v34, %v1249_v24 }
 0x26b   :  { %v1176_v16 = vsel %vm1112_vm13, %v1069_v31, %v1144_v14 }
 0x26c   :  { %1326 = vst.msk [vmem:[%s2263_s9 + $0x50] sm:$0xff] %vm1315_vm2, %v1250_v35  ;;  %1296 = vmatmul.f32.gmra.mxu1 %v1176_v16 }
 0x26e   :  { %v1071_v38 = vpop.f32.mrf.mxu0 }
 0x26f   :  { %v1072_v27 = vadd.f32 %v2038_v61, %v1071_v38 }
 0x271   :  { %v1145_v6 = vmul.f32 0.1, %v1072_v27  ;;  %v1252_v45 = vpop.f32.mrf.mxu1  ;;  %vm1113_vm14 = vcmp.gt.f32.partialorder %v1072_v27, 0.0 }
 0x272   :  { %v1253_v20 = vadd.f32 %v2076_v34, %v1252_v45 }
 0x273   :  { %v1177_v46 = vsel %vm1113_vm14, %v1072_v27, %v1145_v6 }
 0x274   :  { %1327 = vst.msk [vmem:[%s2263_s9 + $0x58] sm:$0xff] %vm1315_vm2, %v1253_v20  ;;  %1299 = vmatmul.f32.gmra.mxu1 %v1177_v46 }
 0x276   :  { %v1074_v22 = vpop.f32.mrf.mxu0 }
 0x277   :  { %v1075_v44 = vadd.f32 %v2038_v61, %v1074_v22 }
 0x279   :  { %v1146_v54 = vmul.f32 0.1, %v1075_v44  ;;  %v1255_v47 = vpop.f32.mrf.mxu1  ;;  %vm1114_vm15 = vcmp.gt.f32.partialorder %v1075_v44, 0.0 }
 0x27a   :  { %v1256_v7 = vadd.f32 %v2076_v34, %v1255_v47 }
 0x27b   :  { %v1178_v37 = vsel %vm1114_vm15, %v1075_v44, %v1146_v54 }
 0x27c   :  { %1328 = vst.msk [vmem:[%s2263_s9 + $0x60] sm:$0xff] %vm1315_vm2, %v1256_v7  ;;  %1302 = vmatmul.f32.gmra.mxu1 %v1178_v37 }
 0x27e   :  { %v1077_v48 = vpop.f32.mrf.mxu0 }
 0x27f   :  { %v1078_v8 = vadd.f32 %v2038_v61, %v1077_v48 }
 0x281   :  { %v1147_v42 = vmul.f32 0.1, %v1078_v8  ;;  %v1258_v49 = vpop.f32.mrf.mxu1  ;;  %vm1115_vm0 = vcmp.gt.f32.partialorder %v1078_v8, 0.0 }
 0x282   :  { %v1259_v50 = vadd.f32 %v2076_v34, %v1258_v49 }
 0x283   :  { %v1179_v57 = vsel %vm1115_vm0, %v1078_v8, %v1147_v42 }
 0x284   :  { %1329 = vst.msk [vmem:[%s2263_s9 + $0x68] sm:$0xff] %vm1315_vm2, %v1259_v50  ;;  %1305 = vmatmul.f32.gmra.mxu1 %v1179_v57 }
 0x286   :  { %v1080_v28 = vpop.f32.mrf.mxu0 }
 0x287   :  { %v1081_v21 = vadd.f32 %v2038_v61, %v1080_v28 }
 0x289   :  { %v1148_v58 = vmul.f32 0.1, %v1081_v21  ;;  %v1261_v36 = vpop.f32.mrf.mxu1  ;;  %vm1116_vm1 = vcmp.gt.f32.partialorder %v1081_v21, 0.0 }
 0x28a   :  { %v1262_v40 = vadd.f32 %v2076_v34, %v1261_v36 }
 0x28b   :  { %v1180_v59 = vsel %vm1116_vm1, %v1081_v21, %v1148_v58 }
 0x28c   :  { %1330 = vst.msk [vmem:[%s2263_s9 + $0x70] sm:$0xff] %vm1315_vm2, %v1262_v40  ;;  %1308 = vmatmul.f32.gmra.mxu1 %v1180_v59 }
 0x291   :  { %v1264_v62 = vpop.f32.mrf.mxu1 }
 0x292   :  { %v1265_v23 = vadd.f32 %v2076_v34, %v1264_v62 }
 0x294   :  { %1331 = vst.msk [vmem:[%s2263_s9 + $0x78] sm:$0xff] %vm1315_vm2, %v1265_v23  ;;  %v1083_v32 = vpop.f32.mrf.mxu2 }
 0x295   :  { %v1084_v55 = vadd.f32 %v2038_v61, %v1083_v32 }
 0x297   :  { %v1149_v1 = vmul.f32 0.1, %v1084_v55  ;;  %vm1117_vm3 = vcmp.gt.f32.partialorder %v1084_v55, 0.0 }
 0x299   :  { %v1267_v63 = vpop.f32.mrf.mxu1  ;;  %v1181_v0 = vsel %vm1117_vm3, %v1084_v55, %v1149_v1 }
 0x29a   :  { %v1268_v39 = vadd.f32 %v2076_v34, %v1267_v63  ;;  %1311 = vmatmul.f32.gmra.mxu1 %v1181_v0 }
 0x29c   :  { %1332 = vst.msk [vmem:[%s2263_s9 + $0x80] sm:$0xff] %vm1315_vm2, %v1268_v39 }
 0x2a1   :  { %v1270_v3 = vpop.f32.mrf.mxu1 }
 0x2a2   :  { %v1271_v51 = vadd.f32 %v2076_v34, %v1270_v3 }
 0x2a4   :  { %1333 = vst.msk [vmem:[%s2263_s9 + $0x88] sm:$0xff] %vm1315_vm2, %v1271_v51 }
 0x2a9   :  { %v1273_v61 = vpop.f32.mrf.mxu1 }
 0x2aa   :  { %v1274_v41 = vadd.f32 %v2076_v34, %v1273_v61 }
 0x2ac   :  { %1334 = vst.msk [vmem:[%s2263_s9 + $0x90] sm:$0xff] %vm1315_vm2, %v1274_v41 }
 0x2b1   :  { %v1276_v10 = vpop.f32.mrf.mxu1 }
 0x2b2   :  { %v1277_v53 = vadd.f32 %v2076_v34, %v1276_v10 }
 0x2b4   :  { %1335 = vst.msk [vmem:[%s2263_s9 + $0x98] sm:$0xff] %vm1315_vm2, %v1277_v53 }
 0x2b9   :  { %v1279_v11 = vpop.f32.mrf.mxu1 }
 0x2ba   :  { %v1280_v12 = vadd.f32 %v2076_v34, %v1279_v11 }
 0x2bc   :  { %1336 = vst.msk [vmem:[%s2263_s9 + $0xa0] sm:$0xff] %vm1315_vm2, %v1280_v12 }
 0x2c1   :  { %v1282_v13 = vpop.f32.mrf.mxu1 }
 0x2c2   :  { %v1283_v17 = vadd.f32 %v2076_v34, %v1282_v13 }
 0x2c4   :  { %1337 = vst.msk [vmem:[%s2263_s9 + $0xa8] sm:$0xff] %vm1315_vm2, %v1283_v17 }
 0x2c9   :  { %v1285_v18 = vpop.f32.mrf.mxu1 }
 0x2ca   :  { %v1286_v19 = vadd.f32 %v2076_v34, %v1285_v18 }
 0x2cc   :  { %1338 = vst.msk [vmem:[%s2263_s9 + $0xb0] sm:$0xff] %vm1315_vm2, %v1286_v19 }
 0x2d1   :  { %v1288_v4 = vpop.f32.mrf.mxu1 }
 0x2d2   :  { %v1289_v60 = vadd.f32 %v2076_v34, %v1288_v4 }
 0x2d4   :  { %1339 = vst.msk [vmem:[%s2263_s9 + $0xb8] sm:$0xff] %vm1315_vm2, %v1289_v60 }
 0x2d9   :  { %v1291_v2 = vpop.f32.mrf.mxu1 }
 0x2da   :  { %v1292_v9 = vadd.f32 %v2076_v34, %v1291_v2 }
 0x2dc   :  { %1340 = vst.msk [vmem:[%s2263_s9 + $0xc0] sm:$0xff] %vm1315_vm2, %v1292_v9 }
 0x2e1   :  { %v1294_v15 = vpop.f32.mrf.mxu1 }
 0x2e2   :  { %v1295_v33 = vadd.f32 %v2076_v34, %v1294_v15 }
 0x2e4   :  { %1341 = vst.msk [vmem:[%s2263_s9 + $0xc8] sm:$0xff] %vm1315_vm2, %v1295_v33 }
 0x2e9   :  { %v1297_v56 = vpop.f32.mrf.mxu1 }
 0x2ea   :  { %v1298_v52 = vadd.f32 %v2076_v34, %v1297_v56 }
 0x2ec   :  { %1342 = vst.msk [vmem:[%s2263_s9 + $0xd0] sm:$0xff] %vm1315_vm2, %v1298_v52 }
 0x2f1   :  { %v1300_v43 = vpop.f32.mrf.mxu1 }
 0x2f2   :  { %v1301_v5 = vadd.f32 %v2076_v34, %v1300_v43 }
 0x2f4   :  { %1343 = vst.msk [vmem:[%s2263_s9 + $0xd8] sm:$0xff] %vm1315_vm2, %v1301_v5 }
 0x2f9   :  { %v1303_v25 = vpop.f32.mrf.mxu1 }
 0x2fa   :  { %v1304_v26 = vadd.f32 %v2076_v34, %v1303_v25 }
 0x2fc   :  { %1344 = vst.msk [vmem:[%s2263_s9 + $0xe0] sm:$0xff] %vm1315_vm2, %v1304_v26 }
 0x301   :  { %v1306_v29 = vpop.f32.mrf.mxu1 }
 0x302   :  { %v1307_v30 = vadd.f32 %v2076_v34, %v1306_v29 }
 0x304   :  { %1345 = vst.msk [vmem:[%s2263_s9 + $0xe8] sm:$0xff] %vm1315_vm2, %v1307_v30 }
 0x309   :  { %v1309_v31 = vpop.f32.mrf.mxu1 }
 0x30a   :  { %v1310_v14 = vadd.f32 %v2076_v34, %v1309_v31 }
 0x30c   :  { %1346 = vst.msk [vmem:[%s2263_s9 + $0xf0] sm:$0xff] %vm1315_vm2, %v1310_v14 }
 0x317   :  { %v1312_v24 = vpop.f32.mrf.mxu1 }
 0x318   :  { %v1313_v35 = vadd.f32 %v2076_v34, %v1312_v24 }
 0x31a   :  { %1347 = vst.msk [vmem:[%s2263_s9 + $0xf8] sm:$0xff] %vm1315_vm2, %v1313_v35 }

</bundles_post_ra>
